<compile_context>
chip_gen: v7x
topology: tpu7x:2x2x1
jax: 0.10.0
libtpu: 0.0.40
codegen_flags: <defaults>
</compile_context>

<pallas_src>
import functools

import jax
import jax.numpy as jnp
from jax import lax
from jax.experimental import pallas as pl
from jax.experimental.pallas import tpu as pltpu

_EPS = 1e-5        # nn.BatchNorm2d default eps
_LANE = 128        # TPU lane width


def _round_up(x, m):
    return (x + m - 1) // m * m


@functools.lru_cache(maxsize=None)
def _vmem_limit():
    """Generation-aware scoped VMEM limit (96 MiB on v5e/v6e, 48 MiB on v7x)."""
    try:
        phys = int(pltpu.get_tpu_info().vmem_capacity_bytes)
    except Exception:
        phys = 64 * 1024 * 1024                       # conservative (v7x per-TC)
    return max(32 * 1024 * 1024, min(phys * 3 // 4, 96 * 1024 * 1024))


def _compiler_params(vlimit):
    return pltpu.CompilerParams(
        dimension_semantics=("parallel",),            # grid steps independent
        vmem_limit_bytes=int(vlimit),
    )


def _pick_rows(m, bytes_per_row, budget, cap=2048):
    """Row tile: multiple of 8, fits `budget`, >=2 tiles when possible (v7x
    megacore), and preferably dividing m so no padded rows / output slicing."""
    m8 = _round_up(max(m, 1), 8)
    tm = min(cap, m8)
    while tm > 8 and tm * bytes_per_row > budget:
        tm //= 2
    tm = max(_round_up(tm, 8), 8)
    if tm >= m8 > 8:                                  # force >= 2 tiles
        tm = _round_up(m8 // 2, 8)
    if m % 8 == 0:
        t = tm
        while t > 8 and m % t:
            t -= 8
        if m % t == 0 and 2 * t >= tm:                # accept divisor if not too small
            tm = t
    return tm, _round_up(m, tm)


# ----------------------------- Pallas kernels --------------------------------
def _matmul_stats_kernel(x_ref, w_ref, y_ref, stats_ref):
    """One M-tile: matmul (bf16 MXU, f32 acc) + per-tile channel stats."""
    y = jnp.dot(x_ref[...], w_ref[...], preferred_element_type=jnp.float32)
    y_ref[...] = y.astype(y_ref.dtype)
    stats_ref[0:1, :] = jnp.sum(y, axis=0, keepdims=True)
    stats_ref[1:2, :] = jnp.sum(y * y, axis=0, keepdims=True)


def _implicit_conv3x3_kernel(*refs, fused_affine_relu):
    """One image: (optional fused BN affine + ReLU) -> zero-pad in VMEM ->
    9 shifted tap matmuls (implicit GEMM) -> raw conv output + channel stats."""
    if fused_affine_relu:
        x_ref, w_ref, sb_ref, y_ref, stats_ref = refs
    else:
        x_ref, w_ref, y_ref, stats_ref = refs
        sb_ref = None
    h, w, cin = x_ref.shape
    cout = y_ref.shape[-1]

    if fused_affine_relu:
        sb = sb_ref[...]                              # [2, cin] f32: (scale, shift)
        a = x_ref[...].astype(jnp.float32)
        a = jnp.maximum(a * sb[0:1, :] + sb[1:2, :], 0.0).astype(jnp.bfloat16)
    else:
        a = x_ref[...].astype(jnp.bfloat16)

    # Zero padding (after the fused affine+ReLU, matching PyTorch conv padding).
    zc = jnp.zeros((h, 1, cin), jnp.bfloat16)
    zr = jnp.zeros((1, w + 2, cin), jnp.bfloat16)
    slab = jnp.concatenate([zr, jnp.concatenate([zc, a, zc], axis=1), zr], axis=0)

    acc = jnp.zeros((h * w, cout), jnp.float32)
    for j in range(3):
        wide = slab[:, j:j + w, :].reshape((h + 2) * w, cin)
        for i in range(3):
            acc = acc + jnp.dot(wide[i * w:i * w + h * w, :], w_ref[i * 3 + j],
                                preferred_element_type=jnp.float32)

    y_ref[...] = acc.astype(y_ref.dtype)
    stats_ref[0:1, :] = jnp.sum(acc, axis=0, keepdims=True)
    stats_ref[1:2, :] = jnp.sum(acc * acc, axis=0, keepdims=True)


def _bn_act_kernel(*refs, relu, res_mode):
    """One M-tile: y*scale+shift (+ residual [optionally with its own affine]) (+ReLU)."""
    if res_mode == "affine":
        y_ref, sb_ref, r_ref, rsb_ref, o_ref = refs
    elif res_mode == "raw":
        y_ref, sb_ref, r_ref, o_ref = refs
    else:
        y_ref, sb_ref, o_ref = refs

    sb = sb_ref[...]                                  # [2, Cpad] f32
    out = y_ref[...].astype(jnp.float32) * sb[0:1, :] + sb[1:2, :]
    if res_mode == "affine":
        rsb = rsb_ref[...]
        out = out + (r_ref[...].astype(jnp.float32) * rsb[0:1, :] + rsb[1:2, :])
    elif res_mode == "raw":
        out = out + r_ref[...].astype(jnp.float32)
    if relu:
        out = jnp.maximum(out, 0.0)
    o_ref[...] = out.astype(o_ref.dtype)


# ----------------------------- pallas_call wrappers ---------------------------
def _matmul_stats(lhs, w_mat, vlimit):
    """Row-tiled matmul + per-tile stats.  Returns bf16 [M, Cpad], stats [T,2,Cpad]."""
    m, k = lhs.shape
    c_pad = w_mat.shape[1]
    # TODO(synk): pipeline_mode=pl.Buffered(1) on the constant weight spec once
    # single-buffering is validated on this Pallas version.
    resident = 2 * k * c_pad * 2
    budget = max(vlimit // 2 - resident, 2 * 1024 * 1024)
    tm, m_pad = _pick_rows(m, 4 * k + 8 * c_pad, budget)
    n_tiles = m_pad // tm
    cost = pl.CostEstimate(
        flops=int(2 * m_pad * k * c_pad), transcendentals=0,
        bytes_accessed=int(m_pad * k * 2 + k * c_pad * 2
                           + m_pad * c_pad * 2 + n_tiles * 2 * c_pad * 4))
    y, stats = pl.pallas_call(
        _matmul_stats_kernel,
        out_shape=(jax.ShapeDtypeStruct((m_pad, c_pad), jnp.bfloat16),
                   jax.ShapeDtypeStruct((n_tiles, 2, c_pad), jnp.float32)),
        grid=(n_tiles,),
        in_specs=[pl.BlockSpec((tm, k), lambda i: (i, 0)),
                  pl.BlockSpec((k, c_pad), lambda i: (0, 0))],     # VMEM-resident
        out_specs=(pl.BlockSpec((tm, c_pad), lambda i: (i, 0)),
                   pl.BlockSpec((None, 2, c_pad), lambda i: (i, 0, 0))),
        compiler_params=_compiler_params(vlimit),
        cost_estimate=cost,
    )(_pad_rows(lhs, m_pad), w_mat)
    return (y if m_pad == m else y[:m]), stats


def _implicit_conv3x3(x_nhwc, w_taps, vlimit, *, sb=None):
    """Implicit-GEMM 3x3 stride-1 conv over a (N,) grid; optionally fuses a
    preceding BN affine + ReLU into the operand path."""
    n, h, w, cin = x_nhwc.shape
    c_pad = w_taps.shape[-1]
    fused = sb is not None
    in_specs = [pl.BlockSpec((None, h, w, cin), lambda b: (b, 0, 0, 0)),
                pl.BlockSpec((9, cin, c_pad), lambda b: (0, 0, 0))]
    args = [x_nhwc, w_taps]
    if fused:
        in_specs.append(pl.BlockSpec((2, cin), lambda b: (0, 0)))
        args.append(sb)
    cost = pl.CostEstimate(
        flops=int(2 * n * h * w * 9 * cin * c_pad), transcendentals=0,
        bytes_accessed=int(n * h * w * cin * 2 + 9 * cin * c_pad * 2
                           + n * h * w * c_pad * 2 + n * 2 * c_pad * 4))
    # TODO(synk): tile over H (manual halo DMA) for very large spatial maps; the
    # per-image slab is plenty small for standard ResNet block sizes.
    y, stats = pl.pallas_call(
        functools.partial(_implicit_conv3x3_kernel, fused_affine_relu=fused),
        out_shape=(jax.ShapeDtypeStruct((n, h * w, c_pad), jnp.bfloat16),
                   jax.ShapeDtypeStruct((n, 2, c_pad), jnp.float32)),
        grid=(n,),
        in_specs=in_specs,
        out_specs=(pl.BlockSpec((None, h * w, c_pad), lambda b: (b, 0, 0)),
                   pl.BlockSpec((None, 2, c_pad), lambda b: (b, 0, 0))),
        compiler_params=_compiler_params(vlimit),
        cost_estimate=cost,
    )(*args)
    return y, stats


def _bn_act(y2d, sb, vlimit, *, residual=None, res_sb=None, relu, out_dtype):
    """Row-tiled BN-apply (+ residual) (+ ReLU) epilogue with its own (large) tile."""
    m, c_pad = y2d.shape
    itemsize = jnp.dtype(out_dtype).itemsize
    bpr = 4 * c_pad + 2 * itemsize * c_pad + (4 * c_pad if residual is not None else 0)
    tm, m_pad = _pick_rows(m, bpr, max(vlimit // 2, 4 * 1024 * 1024))
    n_tiles = m_pad // tm
    tile = pl.BlockSpec((tm, c_pad), lambda i: (i, 0))
    vec = pl.BlockSpec((2, c_pad), lambda i: (0, 0))            # resident scale/shift
    args, in_specs, res_mode = [_pad_rows(y2d, m_pad), sb], [tile, vec], None
    if residual is not None:
        args.append(_pad_rows(residual, m_pad))
        in_specs.append(tile)
        res_mode = "raw"
        if res_sb is not None:
            args.append(res_sb)
            in_specs.append(vec)
            res_mode = "affine"
    out = pl.pallas_call(
        functools.partial(_bn_act_kernel, relu=relu, res_mode=res_mode),
        out_shape=jax.ShapeDtypeStruct((m_pad, c_pad), out_dtype),
        grid=(n_tiles,),
        in_specs=in_specs,
        out_specs=tile,
        compiler_params=_compiler_params(vlimit),
    )(*args)
    return out if m_pad == m else out[:m]


def _bn_affine(stats, gamma, beta, m_true):
    """Fold per-tile (sum, sumsq) partials into per-channel scale/shift [2, Cpad]."""
    s = jnp.sum(stats, axis=0)                                  # (2, Cpad)
    mean = s[0] / m_true
    var = jnp.maximum(s[1] / m_true - mean * mean, 0.0)         # guard fp cancellation
    # TODO(synk): Welford-style centered partials if E[x^2]-E[x]^2 drifts at huge M.
    scale = gamma * lax.rsqrt(var + _EPS)
    shift = beta - mean * scale
    return jnp.stack([scale, shift], axis=0)


# ------------------------------- layout glue -----------------------------------
def _im2col(x_nhwc, kh, kw, stride, padding):
    """NHWC (bf16) -> [N*Ho*Wo, kh*kw*C] patch matrix (stride-2 conv1 fallback)."""
    n, h, w, c = x_nhwc.shape
    xp = jnp.pad(x_nhwc, ((0, 0), (padding, padding), (padding, padding), (0, 0)))
    ho = (h + 2 * padding - kh) // stride + 1
    wo = (w + 2 * padding - kw) // stride + 1
    cols = []
    for i in range(kh):
        for j in range(kw):
            cols.append(lax.slice(
                xp, (0, i, j, 0),
                (n, i + (ho - 1) * stride + 1, j + (wo - 1) * stride + 1, c),
                (1, stride, stride, 1)))
    patches = jnp.concatenate(cols, axis=-1)
    return patches.reshape(n * ho * wo, kh * kw * c), (ho, wo)


def _pad_rows(a, m_pad):
    return a if a.shape[0] == m_pad else jnp.pad(a, ((0, m_pad - a.shape[0]), (0, 0)))


def _pad_vec(v, c_pad):
    return jnp.pad(v.astype(jnp.float32), (0, c_pad - v.shape[0]))


def _weight_to_taps(w, cin_pad, cout_pad):
    """[c_out, c_in, kh, kw] -> bf16 [kh*kw, cin_pad, cout_pad] (im2col tap order)."""
    c_out, c_in, kh, kw = w.shape
    t = jnp.transpose(w, (2, 3, 1, 0)).reshape(kh * kw, c_in, c_out)
    t = jnp.pad(t, ((0, 0), (0, cin_pad - c_in), (0, cout_pad - c_out)))
    return t.astype(jnp.bfloat16)


def _as_conv_weight(key, c_out, c_in, k):
    """ASConv2d: Conv2d kaiming init -> initialize() SVD factors -> forward() weight_ann."""
    fan_in = c_in * k * k
    bound = 1.0 / (fan_in ** 0.5)                     # kaiming_uniform_(a=sqrt(5)) bound
    w = jax.random.uniform(key, (c_out, c_in, k, k), jnp.float32, -bound, bound)
    org = w.reshape(k, k, c_out, c_in)                # initialize(): reshape (NOT permute)
    u, sigma, vh = jnp.linalg.svd(org, full_matrices=False)
    rec = jnp.einsum("xyor,xyr,xyrc->xyoc", u, sigma, vh)       # U @ diag(sigma) @ Vh
    return jnp.transpose(rec, (2, 3, 0, 1))                     # [c_out, c_in, k, k]


def make_block_params(key, inplanes, planes, stride):
    """Init BasicBlock params and pre-lay-out weights / BN vectors (hoisted, once)."""
    k1, k2, k3 = jax.random.split(key, 3)
    c_pad = _round_up(planes, _LANE)
    params = {
        "w1t": _weight_to_taps(_as_conv_weight(k1, planes, inplanes, 3), inplanes, c_pad),
        "g1": _pad_vec(jnp.ones((planes,)), c_pad),
        "b1": _pad_vec(jnp.zeros((planes,)), c_pad),
        "w2t": _weight_to_taps(_as_conv_weight(k2, planes, planes, 3), c_pad, c_pad),
        "g2": _pad_vec(jnp.ones((planes,)), c_pad),
        "b2": _pad_vec(jnp.zeros((planes,)), c_pad),
    }
    if stride != 1 or inplanes != planes:
        # downsample = ASConv2d(inplanes, planes, stride=2, ksize=1, padding=0)
        params["wdt"] = _weight_to_taps(_as_conv_weight(k3, planes, inplanes, 1),
                                        inplanes, c_pad)
        params["gd"] = _pad_vec(jnp.ones((planes,)), c_pad)
        params["bd"] = _pad_vec(jnp.zeros((planes,)), c_pad)
    return params


# ------------------------------- forward pass ----------------------------------
@functools.partial(jax.jit, static_argnames=("stride", "planes"))
def basic_block_forward(x_nchw, params, *, stride, planes):
    """BasicBlock.forward with use_ann=True (conv->BN->ReLU, conv->BN, +res, ReLU)."""
    n, c_in, h, w = x_nchw.shape
    c_pad = params["w1t"].shape[-1]
    vlimit = _vmem_limit()
    x = jnp.transpose(x_nchw, (0, 2, 3, 1)).astype(jnp.bfloat16)        # NHWC bf16
    # TODO(synk): keep activations NHWC (bf16) across blocks in a full network to
    # drop the per-block NCHW<->NHWC transposes and the f32 inter-block store.

    # ---- conv1: 3x3, stride, pad 1 ----
    if stride == 1:
        ho, wo = h, w
        m_out = n * ho * wo
        y1, st1 = _implicit_conv3x3(x, params["w1t"], vlimit)           # implicit GEMM
        y1_nhwc = y1.reshape(n, ho, wo, c_pad)
    else:
        # TODO(synk): strided implicit-GEMM path; stride-2 conv1 uses tiled im2col.
        p1, (ho, wo) = _im2col(x, 3, 3, stride, 1)
        m_out = n * ho * wo
        y1_flat, st1 = _matmul_stats(p1, params["w1t"].reshape(-1, c_pad), vlimit)
        y1_nhwc = y1_flat.reshape(n, ho, wo, c_pad)
    sb1 = _bn_affine(st1, params["g1"], params["b1"], m_out)

    # ---- residual branch ----
    if "wdt" in params:
        # downsample conv (1x1, stride 2, no im2col amplification); its downbn_ann
        # affine is folded into the conv2 epilogue (raw conv output + scale/shift).
        xd = x[:, ::2, ::2, :]
        hd, wd = xd.shape[1], xd.shape[2]
        res, std = _matmul_stats(xd.reshape(n * hd * wd, c_in),
                                 params["wdt"].reshape(c_in, c_pad), vlimit)
        res_sb = _bn_affine(std, params["gd"], params["bd"], n * hd * wd)
    else:
        # identity residual (stride == 1 and inplanes == planes)
        res = jnp.pad(x.reshape(n * h * w, c_in), ((0, 0), (0, c_pad - c_in)))
        res_sb = None

    # ---- conv2: 3x3, stride 1, pad 1 with bn1_ann + relu1 fused into its operand
    y2, st2 = _implicit_conv3x3(y1_nhwc, params["w2t"], vlimit, sb=sb1)
    sb2 = _bn_affine(st2, params["g2"], params["b2"], m_out)

    # ---- bn2_ann -> (+ residual) -> relu2 epilogue (own, larger row tile) ----
    # TODO(synk): out_dtype=bf16 for the inter-block tensor on v5e (HBM-bound).
    out = _bn_act(y2.reshape(m_out, c_pad), sb2, vlimit,
                  residual=res, res_sb=res_sb, relu=True, out_dtype=jnp.float32)
    out = out[:, :planes].reshape(n, ho, wo, planes)
    return jnp.transpose(out, (0, 3, 1, 2))                              # back to NCHW

# TODO(synk): SNN branch (use_ann=False: LIFSpike, bn*_snn, SeqToANNContainer
# time-dim flattening) is not exercised by the default forward and is omitted.
# BatchNorm running-stats (momentum) updates are a training side effect and are
# not modeled; normalization uses batch statistics (training-mode semantics).


if __name__ == "__main__":
    key = jax.random.PRNGKey(0)
    kp, kx, kp2, kx2 = jax.random.split(key, 4)

    # Downsample block: stride 2, inplanes != planes (exercises the im2col conv1
    # path, the 1x1 downsample conv, and the folded downbn affine in the epilogue).
    n, inplanes, planes, h, w, stride = 2, 4, 8, 16, 16, 2
    x = jax.random.normal(kx, (n, inplanes, h, w), jnp.float32)
    params = make_block_params(kp, inplanes, planes, stride)
    out = jax.block_until_ready(
        basic_block_forward(x, params, stride=stride, planes=planes))
    assert out.shape == (n, planes, h // stride, w // stride), out.shape
    assert out.dtype == jnp.float32
    assert bool(jnp.all(jnp.isfinite(out)))
    assert bool(jnp.all(out >= 0.0))                  # final ReLU

    # Identity block: stride 1, inplanes == planes (exercises the implicit-GEMM
    # conv1 path and the identity residual).
    n2, planes2, h2, w2 = 2, 8, 16, 16
    x2 = jax.random.normal(kx2, (n2, planes2, h2, w2), jnp.float32)
    params2 = make_block_params(kp2, planes2, planes2, 1)
    out2 = jax.block_until_ready(
        basic_block_forward(x2, params2, stride=1, planes=planes2))
    assert out2.shape == (n2, planes2, h2, w2), out2.shape
    assert bool(jnp.all(jnp.isfinite(out2)))
    assert bool(jnp.all(out2 >= 0.0))

    print("KERNEL_OK")
</pallas_src>

<mosaic_0001>
module attributes {stable_mosaic.version = 11 : i64} {
  func.func @_matmul_stats_kernel(%arg0: i32, %arg1: memref<64x36xbf16, #tpu.memory_space<vmem>>, %arg2: memref<36x128xbf16, #tpu.memory_space<vmem>>, %arg3: memref<64x128xbf16, #tpu.memory_space<vmem>>, %arg4: memref<1x2x128xf32, #tpu.memory_space<vmem>>) attributes {dimension_semantics = [#tpu.dimension_semantics<parallel>], iteration_bounds = array<i64: 2>, scalar_prefetch = 0 : i64, scratch_operands = 0 : i64, tpu.core_type = #tpu.core_type<tc>, window_params = [{transform_indices = @transform_0, window_bounds = array<i64: 64, 36>}, {pipeline_mode = #tpu.pipeline_mode<synchronous>, transform_indices = @transform_1, window_bounds = array<i64: 36, 128>}, {transform_indices = @transform_2, window_bounds = array<i64: 64, 128>}, {transform_indices = @transform_3, window_bounds = array<i64: 1, 2, 128>}]} {
    %c0 = arith.constant 0 : index
    %c0_0 = arith.constant 0 : index
    %0 = vector.load %arg1[%c0, %c0_0] : memref<64x36xbf16, #tpu.memory_space<vmem>>, vector<64x36xbf16>
    %c0_1 = arith.constant 0 : index
    %c0_2 = arith.constant 0 : index
    %1 = vector.load %arg2[%c0_1, %c0_2] : memref<36x128xbf16, #tpu.memory_space<vmem>>, vector<36x128xbf16>
    %cst = arith.constant dense<0.000000e+00> : vector<64x128xf32>
    %2 = tpu.matmul %0, %1, %cst {dimension_numbers = #tpu.dot_dimension_numbers<[1], [0], [0], [1], [0, 0, 1, 1], [], []>} : vector<64x36xbf16>, vector<36x128xbf16>, vector<64x128xf32> -> vector<64x128xf32>
    %3 = arith.truncf %2 : vector<64x128xf32> to vector<64x128xbf16>
    %c0_3 = arith.constant 0 : index
    %c0_4 = arith.constant 0 : index
    %4 = vector.load %arg3[%c0_3, %c0_4] : memref<64x128xbf16, #tpu.memory_space<vmem>>, vector<64x128xbf16>
    tpu.vector_store %arg3[%c0_3, %c0_4], %3 {strides = array<i32>} : memref<64x128xbf16, #tpu.memory_space<vmem>>, vector<64x128xbf16>,
    %cst_5 = arith.constant dense<0.000000e+00> : vector<128xf32>
    %5 = vector.multi_reduction <add>, %2, %cst_5 [0] : vector<64x128xf32> to vector<128xf32>
    %6 = vector.shape_cast %5 : vector<128xf32> to vector<1x128xf32>
    %c0_6 = arith.constant 0 : index
    %c0_7 = arith.constant 0 : index
    %c0_8 = arith.constant 0 : index
    %7 = vector.load %arg4[%c0_6, %c0_7, %c0_8] : memref<1x2x128xf32, #tpu.memory_space<vmem>>, vector<1x1x128xf32>
    %8 = vector.shape_cast %7 : vector<1x1x128xf32> to vector<1x128xf32>
    %9 = vector.shape_cast %6 : vector<1x128xf32> to vector<1x1x128xf32>
    tpu.vector_store %arg4[%c0_6, %c0_7, %c0_8], %9 {strides = array<i32>} : memref<1x2x128xf32, #tpu.memory_space<vmem>>, vector<1x1x128xf32>,
    %10 = arith.mulf %2, %2 : vector<64x128xf32>
    %cst_9 = arith.constant dense<0.000000e+00> : vector<128xf32>
    %11 = vector.multi_reduction <add>, %10, %cst_9 [0] : vector<64x128xf32> to vector<128xf32>
    %12 = vector.shape_cast %11 : vector<128xf32> to vector<1x128xf32>
    %c0_10 = arith.constant 0 : index
    %c1 = arith.constant 1 : index
    %c0_11 = arith.constant 0 : index
    %13 = vector.load %arg4[%c0_10, %c1, %c0_11] : memref<1x2x128xf32, #tpu.memory_space<vmem>>, vector<1x1x128xf32>
    %14 = vector.shape_cast %13 : vector<1x1x128xf32> to vector<1x128xf32>
    %15 = vector.shape_cast %12 : vector<1x128xf32> to vector<1x1x128xf32>
    tpu.vector_store %arg4[%c0_10, %c1, %c0_11], %15 {strides = array<i32>} : memref<1x2x128xf32, #tpu.memory_space<vmem>>, vector<1x1x128xf32>,
    return
  }
  func.func @transform_0(%arg0: i32) -> (i32, i32) {
    %c0_i32 = arith.constant 0 : i32
    %c0_i32_0 = arith.constant 0 : i32
    return %arg0, %c0_i32 : i32, i32
  }
  func.func @transform_1(%arg0: i32) -> (i32, i32) {
    %c0_i32 = arith.constant 0 : i32
    %c0_i32_0 = arith.constant 0 : i32
    %c0_i32_1 = arith.constant 0 : i32
    return %c0_i32, %c0_i32_0 : i32, i32
  }
  func.func @transform_2(%arg0: i32) -> (i32, i32) {
    %c0_i32 = arith.constant 0 : i32
    %c0_i32_0 = arith.constant 0 : i32
    return %arg0, %c0_i32 : i32, i32
  }
  func.func @transform_3(%arg0: i32) -> (i32, i32, i32) {
    %c0_i32 = arith.constant 0 : i32
    %c0_i32_0 = arith.constant 0 : i32
    %c0_i32_1 = arith.constant 0 : i32
    return %arg0, %c0_i32, %c0_i32_0 : i32, i32, i32
  }
}

module attributes {stable_mosaic.version = 11 : i64} {
  func.func @_matmul_stats_kernel(%arg0: i32, %arg1: memref<64x4xbf16, #tpu.memory_space<vmem>>, %arg2: memref<4x128xbf16, #tpu.memory_space<vmem>>, %arg3: memref<64x128xbf16, #tpu.memory_space<vmem>>, %arg4: memref<1x2x128xf32, #tpu.memory_space<vmem>>) attributes {dimension_semantics = [#tpu.dimension_semantics<parallel>], iteration_bounds = array<i64: 2>, scalar_prefetch = 0 : i64, scratch_operands = 0 : i64, tpu.core_type = #tpu.core_type<tc>, window_params = [{transform_indices = @transform_0, window_bounds = array<i64: 64, 4>}, {pipeline_mode = #tpu.pipeline_mode<synchronous>, transform_indices = @transform_1, window_bounds = array<i64: 4, 128>}, {transform_indices = @transform_2, window_bounds = array<i64: 64, 128>}, {transform_indices = @transform_3, window_bounds = array<i64: 1, 2, 128>}]} {
    %c0 = arith.constant 0 : index
    %c0_0 = arith.constant 0 : index
    %0 = vector.load %arg1[%c0, %c0_0] : memref<64x4xbf16, #tpu.memory_space<vmem>>, vector<64x4xbf16>
    %c0_1 = arith.constant 0 : index
    %c0_2 = arith.constant 0 : index
    %1 = vector.load %arg2[%c0_1, %c0_2] : memref<4x128xbf16, #tpu.memory_space<vmem>>, vector<4x128xbf16>
    %cst = arith.constant dense<0.000000e+00> : vector<64x128xf32>
    %2 = tpu.matmul %0, %1, %cst {dimension_numbers = #tpu.dot_dimension_numbers<[1], [0], [0], [1], [0, 0, 1, 1], [], []>} : vector<64x4xbf16>, vector<4x128xbf16>, vector<64x128xf32> -> vector<64x128xf32>
    %3 = arith.truncf %2 : vector<64x128xf32> to vector<64x128xbf16>
    %c0_3 = arith.constant 0 : index
    %c0_4 = arith.constant 0 : index
    %4 = vector.load %arg3[%c0_3, %c0_4] : memref<64x128xbf16, #tpu.memory_space<vmem>>, vector<64x128xbf16>
    tpu.vector_store %arg3[%c0_3, %c0_4], %3 {strides = array<i32>} : memref<64x128xbf16, #tpu.memory_space<vmem>>, vector<64x128xbf16>,
    %cst_5 = arith.constant dense<0.000000e+00> : vector<128xf32>
    %5 = vector.multi_reduction <add>, %2, %cst_5 [0] : vector<64x128xf32> to vector<128xf32>
    %6 = vector.shape_cast %5 : vector<128xf32> to vector<1x128xf32>
    %c0_6 = arith.constant 0 : index
    %c0_7 = arith.constant 0 : index
    %c0_8 = arith.constant 0 : index
    %7 = vector.load %arg4[%c0_6, %c0_7, %c0_8] : memref<1x2x128xf32, #tpu.memory_space<vmem>>, vector<1x1x128xf32>
    %8 = vector.shape_cast %7 : vector<1x1x128xf32> to vector<1x128xf32>
    %9 = vector.shape_cast %6 : vector<1x128xf32> to vector<1x1x128xf32>
    tpu.vector_store %arg4[%c0_6, %c0_7, %c0_8], %9 {strides = array<i32>} : memref<1x2x128xf32, #tpu.memory_space<vmem>>, vector<1x1x128xf32>,
    %10 = arith.mulf %2, %2 : vector<64x128xf32>
    %cst_9 = arith.constant dense<0.000000e+00> : vector<128xf32>
    %11 = vector.multi_reduction <add>, %10, %cst_9 [0] : vector<64x128xf32> to vector<128xf32>
    %12 = vector.shape_cast %11 : vector<128xf32> to vector<1x128xf32>
    %c0_10 = arith.constant 0 : index
    %c1 = arith.constant 1 : index
    %c0_11 = arith.constant 0 : index
    %13 = vector.load %arg4[%c0_10, %c1, %c0_11] : memref<1x2x128xf32, #tpu.memory_space<vmem>>, vector<1x1x128xf32>
    %14 = vector.shape_cast %13 : vector<1x1x128xf32> to vector<1x128xf32>
    %15 = vector.shape_cast %12 : vector<1x128xf32> to vector<1x1x128xf32>
    tpu.vector_store %arg4[%c0_10, %c1, %c0_11], %15 {strides = array<i32>} : memref<1x2x128xf32, #tpu.memory_space<vmem>>, vector<1x1x128xf32>,
    return
  }
  func.func @transform_0(%arg0: i32) -> (i32, i32) {
    %c0_i32 = arith.constant 0 : i32
    %c0_i32_0 = arith.constant 0 : i32
    return %arg0, %c0_i32 : i32, i32
  }
  func.func @transform_1(%arg0: i32) -> (i32, i32) {
    %c0_i32 = arith.constant 0 : i32
    %c0_i32_0 = arith.constant 0 : i32
    %c0_i32_1 = arith.constant 0 : i32
    return %c0_i32, %c0_i32_0 : i32, i32
  }
  func.func @transform_2(%arg0: i32) -> (i32, i32) {
    %c0_i32 = arith.constant 0 : i32
    %c0_i32_0 = arith.constant 0 : i32
    return %arg0, %c0_i32 : i32, i32
  }
  func.func @transform_3(%arg0: i32) -> (i32, i32, i32) {
    %c0_i32 = arith.constant 0 : i32
    %c0_i32_0 = arith.constant 0 : i32
    %c0_i32_1 = arith.constant 0 : i32
    return %arg0, %c0_i32, %c0_i32_0 : i32, i32, i32
  }
}

module attributes {stable_mosaic.version = 11 : i64} {
  func.func @_implicit_conv3x3_kernel(%arg0: i32, %arg1: memref<1x8x8x128xbf16, #tpu.memory_space<vmem>>, %arg2: memref<9x128x128xbf16, #tpu.memory_space<vmem>>, %arg3: memref<2x128xf32, #tpu.memory_space<vmem>>, %arg4: memref<1x64x128xbf16, #tpu.memory_space<vmem>>, %arg5: memref<1x2x128xf32, #tpu.memory_space<vmem>>) attributes {dimension_semantics = [#tpu.dimension_semantics<parallel>], iteration_bounds = array<i64: 2>, scalar_prefetch = 0 : i64, scratch_operands = 0 : i64, tpu.core_type = #tpu.core_type<tc>, window_params = [{transform_indices = @transform_0, window_bounds = array<i64: 1, 8, 8, 128>}, {pipeline_mode = #tpu.pipeline_mode<synchronous>, transform_indices = @transform_1, window_bounds = array<i64: 9, 128, 128>}, {pipeline_mode = #tpu.pipeline_mode<synchronous>, transform_indices = @transform_2, window_bounds = array<i64: 2, 128>}, {transform_indices = @transform_3, window_bounds = array<i64: 1, 64, 128>}, {transform_indices = @transform_4, window_bounds = array<i64: 1, 2, 128>}]} {
    %c0 = arith.constant 0 : index
    %c0_0 = arith.constant 0 : index
    %0 = vector.load %arg3[%c0, %c0_0] : memref<2x128xf32, #tpu.memory_space<vmem>>, vector<2x128xf32>
    %c0_1 = arith.constant 0 : index
    %c0_2 = arith.constant 0 : index
    %c0_3 = arith.constant 0 : index
    %c0_4 = arith.constant 0 : index
    %1 = vector.load %arg1[%c0_1, %c0_2, %c0_3, %c0_4] : memref<1x8x8x128xbf16, #tpu.memory_space<vmem>>, vector<1x8x8x128xbf16>
    %2 = vector.shape_cast %1 : vector<1x8x8x128xbf16> to vector<8x8x128xbf16>
    %3 = arith.extf %2 : vector<8x8x128xbf16> to vector<8x8x128xf32>
    %4 = vector.extract_strided_slice %0 {offsets = [0, 0], sizes = [1, 128], strides = [1, 1]} : vector<2x128xf32> to vector<1x128xf32>
    %5 = vector.shape_cast %4 : vector<1x128xf32> to vector<1x1x128xf32>
    %6 = vector.broadcast %5 : vector<1x1x128xf32> to vector<8x8x128xf32>
    %7 = arith.mulf %3, %6 : vector<8x8x128xf32>
    %8 = vector.extract_strided_slice %0 {offsets = [1, 0], sizes = [1, 128], strides = [1, 1]} : vector<2x128xf32> to vector<1x128xf32>
    %9 = vector.shape_cast %8 : vector<1x128xf32> to vector<1x1x128xf32>
    %10 = vector.broadcast %9 : vector<1x1x128xf32> to vector<8x8x128xf32>
    %11 = arith.addf %7, %10 : vector<8x8x128xf32>
    %cst = arith.constant 0.000000e+00 : f32
    %12 = vector.broadcast %cst : f32 to vector<8x8x128xf32>
    %13 = arith.maximumf %11, %12 : vector<8x8x128xf32>
    %14 = arith.truncf %13 : vector<8x8x128xf32> to vector<8x8x128xbf16>
    %cst_5 = arith.constant 0.000000e+00 : bf16
    %15 = vector.broadcast %cst_5 : bf16 to vector<8x1x128xbf16>
    %cst_6 = arith.constant 0.000000e+00 : bf16
    %16 = vector.broadcast %cst_6 : bf16 to vector<1x10x128xbf16>
    %17 = tpu.concatenate %15, %14, %15 in 1 : vector<8x1x128xbf16>, vector<8x8x128xbf16>, vector<8x1x128xbf16> -> vector<8x10x128xbf16>
    %18 = tpu.concatenate %16, %17, %16 in 0 : vector<1x10x128xbf16>, vector<8x10x128xbf16>, vector<1x10x128xbf16> -> vector<10x10x128xbf16>
    %cst_7 = arith.constant 0.000000e+00 : f32
    %19 = vector.broadcast %cst_7 : f32 to vector<64x128xf32>
    %20 = vector.extract_strided_slice %18 {offsets = [0, 0, 0], sizes = [10, 8, 128], strides = [1, 1, 1]} : vector<10x10x128xbf16> to vector<10x8x128xbf16>
    %21 = vector.shape_cast %20 : vector<10x8x128xbf16> to vector<80x128xbf16>
    %22 = vector.extract_strided_slice %21 {offsets = [0, 0], sizes = [64, 128], strides = [1, 1]} : vector<80x128xbf16> to vector<64x128xbf16>
    %c0_8 = arith.constant 0 : index
    %c0_9 = arith.constant 0 : index
    %c0_10 = arith.constant 0 : index
    %23 = vector.load %arg2[%c0_8, %c0_9, %c0_10] : memref<9x128x128xbf16, #tpu.memory_space<vmem>>, vector<1x128x128xbf16>
    %24 = vector.shape_cast %23 : vector<1x128x128xbf16> to vector<128x128xbf16>
    %cst_11 = arith.constant dense<0.000000e+00> : vector<64x128xf32>
    %25 = tpu.matmul %22, %24, %cst_11 {dimension_numbers = #tpu.dot_dimension_numbers<[1], [0], [0], [1], [0, 0, 1, 1], [], []>} : vector<64x128xbf16>, vector<128x128xbf16>, vector<64x128xf32> -> vector<64x128xf32>
    %26 = arith.addf %19, %25 : vector<64x128xf32>
    %27 = vector.extract_strided_slice %21 {offsets = [8, 0], sizes = [64, 128], strides = [1, 1]} : vector<80x128xbf16> to vector<64x128xbf16>
    %c3 = arith.constant 3 : index
    %c0_12 = arith.constant 0 : index
    %c0_13 = arith.constant 0 : index
    %28 = vector.load %arg2[%c3, %c0_12, %c0_13] : memref<9x128x128xbf16, #tpu.memory_space<vmem>>, vector<1x128x128xbf16>
    %29 = vector.shape_cast %28 : vector<1x128x128xbf16> to vector<128x128xbf16>
    %cst_14 = arith.constant dense<0.000000e+00> : vector<64x128xf32>
    %30 = tpu.matmul %27, %29, %cst_14 {dimension_numbers = #tpu.dot_dimension_numbers<[1], [0], [0], [1], [0, 0, 1, 1], [], []>} : vector<64x128xbf16>, vector<128x128xbf16>, vector<64x128xf32> -> vector<64x128xf32>
    %31 = arith.addf %26, %30 : vector<64x128xf32>
    %32 = vector.extract_strided_slice %21 {offsets = [16, 0], sizes = [64, 128], strides = [1, 1]} : vector<80x128xbf16> to vector<64x128xbf16>
    %c6 = arith.constant 6 : index
    %c0_15 = arith.constant 0 : index
    %c0_16 = arith.constant 0 : index
    %33 = vector.load %arg2[%c6, %c0_15, %c0_16] : memref<9x128x128xbf16, #tpu.memory_space<vmem>>, vector<1x128x128xbf16>
    %34 = vector.shape_cast %33 : vector<1x128x128xbf16> to vector<128x128xbf16>
    %cst_17 = arith.constant dense<0.000000e+00> : vector<64x128xf32>
    %35 = tpu.matmul %32, %34, %cst_17 {dimension_numbers = #tpu.dot_dimension_numbers<[1], [0], [0], [1], [0, 0, 1, 1], [], []>} : vector<64x128xbf16>, vector<128x128xbf16>, vector<64x128xf32> -> vector<64x128xf32>
    %36 = arith.addf %31, %35 : vector<64x128xf32>
    %37 = vector.extract_strided_slice %18 {offsets = [0, 1, 0], sizes = [10, 8, 128], strides = [1, 1, 1]} : vector<10x10x128xbf16> to vector<10x8x128xbf16>
    %38 = vector.shape_cast %37 : vector<10x8x128xbf16> to vector<80x128xbf16>
    %39 = vector.extract_strided_slice %38 {offsets = [0, 0], sizes = [64, 128], strides = [1, 1]} : vector<80x128xbf16> to vector<64x128xbf16>
    %c1 = arith.constant 1 : index
    %c0_18 = arith.constant 0 : index
    %c0_19 = arith.constant 0 : index
    %40 = vector.load %arg2[%c1, %c0_18, %c0_19] : memref<9x128x128xbf16, #tpu.memory_space<vmem>>, vector<1x128x128xbf16>
    %41 = vector.shape_cast %40 : vector<1x128x128xbf16> to vector<128x128xbf16>
    %cst_20 = arith.constant dense<0.000000e+00> : vector<64x128xf32>
    %42 = tpu.matmul %39, %41, %cst_20 {dimension_numbers = #tpu.dot_dimension_numbers<[1], [0], [0], [1], [0, 0, 1, 1], [], []>} : vector<64x128xbf16>, vector<128x128xbf16>, vector<64x128xf32> -> vector<64x128xf32>
    %43 = arith.addf %36, %42 : vector<64x128xf32>
    %44 = vector.extract_strided_slice %38 {offsets = [8, 0], sizes = [64, 128], strides = [1, 1]} : vector<80x128xbf16> to vector<64x128xbf16>
    %c4 = arith.constant 4 : index
    %c0_21 = arith.constant 0 : index
    %c0_22 = arith.constant 0 : index
    %45 = vector.load %arg2[%c4, %c0_21, %c0_22] : memref<9x128x128xbf16, #tpu.memory_space<vmem>>, vector<1x128x128xbf16>
    %46 = vector.shape_cast %45 : vector<1x128x128xbf16> to vector<128x128xbf16>
    %cst_23 = arith.constant dense<0.000000e+00> : vector<64x128xf32>
    %47 = tpu.matmul %44, %46, %cst_23 {dimension_numbers = #tpu.dot_dimension_numbers<[1], [0], [0], [1], [0, 0, 1, 1], [], []>} : vector<64x128xbf16>, vector<128x128xbf16>, vector<64x128xf32> -> vector<64x128xf32>
    %48 = arith.addf %43, %47 : vector<64x128xf32>
    %49 = vector.extract_strided_slice %38 {offsets = [16, 0], sizes = [64, 128], strides = [1, 1]} : vector<80x128xbf16> to vector<64x128xbf16>
    %c7 = arith.constant 7 : index
    %c0_24 = arith.constant 0 : index
    %c0_25 = arith.constant 0 : index
    %50 = vector.load %arg2[%c7, %c0_24, %c0_25] : memref<9x128x128xbf16, #tpu.memory_space<vmem>>, vector<1x128x128xbf16>
    %51 = vector.shape_cast %50 : vector<1x128x128xbf16> to vector<128x128xbf16>
    %cst_26 = arith.constant dense<0.000000e+00> : vector<64x128xf32>
    %52 = tpu.matmul %49, %51, %cst_26 {dimension_numbers = #tpu.dot_dimension_numbers<[1], [0], [0], [1], [0, 0, 1, 1], [], []>} : vector<64x128xbf16>, vector<128x128xbf16>, vector<64x128xf32> -> vector<64x128xf32>
    %53 = arith.addf %48, %52 : vector<64x128xf32>
    %54 = vector.extract_strided_slice %18 {offsets = [0, 2, 0], sizes = [10, 8, 128], strides = [1, 1, 1]} : vector<10x10x128xbf16> to vector<10x8x128xbf16>
    %55 = vector.shape_cast %54 : vector<10x8x128xbf16> to vector<80x128xbf16>
    %56 = vector.extract_strided_slice %55 {offsets = [0, 0], sizes = [64, 128], strides = [1, 1]} : vector<80x128xbf16> to vector<64x128xbf16>
    %c2 = arith.constant 2 : index
    %c0_27 = arith.constant 0 : index
    %c0_28 = arith.constant 0 : index
    %57 = vector.load %arg2[%c2, %c0_27, %c0_28] : memref<9x128x128xbf16, #tpu.memory_space<vmem>>, vector<1x128x128xbf16>
    %58 = vector.shape_cast %57 : vector<1x128x128xbf16> to vector<128x128xbf16>
    %cst_29 = arith.constant dense<0.000000e+00> : vector<64x128xf32>
    %59 = tpu.matmul %56, %58, %cst_29 {dimension_numbers = #tpu.dot_dimension_numbers<[1], [0], [0], [1], [0, 0, 1, 1], [], []>} : vector<64x128xbf16>, vector<128x128xbf16>, vector<64x128xf32> -> vector<64x128xf32>
    %60 = arith.addf %53, %59 : vector<64x128xf32>
    %61 = vector.extract_strided_slice %55 {offsets = [8, 0], sizes = [64, 128], strides = [1, 1]} : vector<80x128xbf16> to vector<64x128xbf16>
    %c5 = arith.constant 5 : index
    %c0_30 = arith.constant 0 : index
    %c0_31 = arith.constant 0 : index
    %62 = vector.load %arg2[%c5, %c0_30, %c0_31] : memref<9x128x128xbf16, #tpu.memory_space<vmem>>, vector<1x128x128xbf16>
    %63 = vector.shape_cast %62 : vector<1x128x128xbf16> to vector<128x128xbf16>
    %cst_32 = arith.constant dense<0.000000e+00> : vector<64x128xf32>
    %64 = tpu.matmul %61, %63, %cst_32 {dimension_numbers = #tpu.dot_dimension_numbers<[1], [0], [0], [1], [0, 0, 1, 1], [], []>} : vector<64x128xbf16>, vector<128x128xbf16>, vector<64x128xf32> -> vector<64x128xf32>
    %65 = arith.addf %60, %64 : vector<64x128xf32>
    %66 = vector.extract_strided_slice %55 {offsets = [16, 0], sizes = [64, 128], strides = [1, 1]} : vector<80x128xbf16> to vector<64x128xbf16>
    %c8 = arith.constant 8 : index
    %c0_33 = arith.constant 0 : index
    %c0_34 = arith.constant 0 : index
    %67 = vector.load %arg2[%c8, %c0_33, %c0_34] : memref<9x128x128xbf16, #tpu.memory_space<vmem>>, vector<1x128x128xbf16>
    %68 = vector.shape_cast %67 : vector<1x128x128xbf16> to vector<128x128xbf16>
    %cst_35 = arith.constant dense<0.000000e+00> : vector<64x128xf32>
    %69 = tpu.matmul %66, %68, %cst_35 {dimension_numbers = #tpu.dot_dimension_numbers<[1], [0], [0], [1], [0, 0, 1, 1], [], []>} : vector<64x128xbf16>, vector<128x128xbf16>, vector<64x128xf32> -> vector<64x128xf32>
    %70 = arith.addf %65, %69 : vector<64x128xf32>
    %71 = arith.truncf %70 : vector<64x128xf32> to vector<64x128xbf16>
    %c0_36 = arith.constant 0 : index
    %c0_37 = arith.constant 0 : index
    %c0_38 = arith.constant 0 : index
    %72 = vector.load %arg4[%c0_36, %c0_37, %c0_38] : memref<1x64x128xbf16, #tpu.memory_space<vmem>>, vector<1x64x128xbf16>
    %73 = vector.shape_cast %72 : vector<1x64x128xbf16> to vector<64x128xbf16>
    %74 = vector.shape_cast %71 : vector<64x128xbf16> to vector<1x64x128xbf16>
    tpu.vector_store %arg4[%c0_36, %c0_37, %c0_38], %74 {strides = array<i32>} : memref<1x64x128xbf16, #tpu.memory_space<vmem>>, vector<1x64x128xbf16>,
    %cst_39 = arith.constant dense<0.000000e+00> : vector<128xf32>
    %75 = vector.multi_reduction <add>, %70, %cst_39 [0] : vector<64x128xf32> to vector<128xf32>
    %76 = vector.shape_cast %75 : vector<128xf32> to vector<1x128xf32>
    %c0_40 = arith.constant 0 : index
    %c0_41 = arith.constant 0 : index
    %c0_42 = arith.constant 0 : index
    %77 = vector.load %arg5[%c0_40, %c0_41, %c0_42] : memref<1x2x128xf32, #tpu.memory_space<vmem>>, vector<1x1x128xf32>
    %78 = vector.shape_cast %77 : vector<1x1x128xf32> to vector<1x128xf32>
    %79 = vector.shape_cast %76 : vector<1x128xf32> to vector<1x1x128xf32>
    tpu.vector_store %arg5[%c0_40, %c0_41, %c0_42], %79 {strides = array<i32>} : memref<1x2x128xf32, #tpu.memory_space<vmem>>, vector<1x1x128xf32>,
    %80 = arith.mulf %70, %70 : vector<64x128xf32>
    %cst_43 = arith.constant dense<0.000000e+00> : vector<128xf32>
    %81 = vector.multi_reduction <add>, %80, %cst_43 [0] : vector<64x128xf32> to vector<128xf32>
    %82 = vector.shape_cast %81 : vector<128xf32> to vector<1x128xf32>
    %c0_44 = arith.constant 0 : index
    %c1_45 = arith.constant 1 : index
    %c0_46 = arith.constant 0 : index
    %83 = vector.load %arg5[%c0_44, %c1_45, %c0_46] : memref<1x2x128xf32, #tpu.memory_space<vmem>>, vector<1x1x128xf32>
    %84 = vector.shape_cast %83 : vector<1x1x128xf32> to vector<1x128xf32>
    %85 = vector.shape_cast %82 : vector<1x128xf32> to vector<1x1x128xf32>
    tpu.vector_store %arg5[%c0_44, %c1_45, %c0_46], %85 {strides = array<i32>} : memref<1x2x128xf32, #tpu.memory_space<vmem>>, vector<1x1x128xf32>,
    return
  }
  func.func @transform_0(%arg0: i32) -> (i32, i32, i32, i32) {
    %c0_i32 = arith.constant 0 : i32
    %c0_i32_0 = arith.constant 0 : i32
    %c0_i32_1 = arith.constant 0 : i32
    %c0_i32_2 = arith.constant 0 : i32
    return %arg0, %c0_i32, %c0_i32_0, %c0_i32_1 : i32, i32, i32, i32
  }
  func.func @transform_1(%arg0: i32) -> (i32, i32, i32) {
    %c0_i32 = arith.constant 0 : i32
    %c0_i32_0 = arith.constant 0 : i32
    %c0_i32_1 = arith.constant 0 : i32
    %c0_i32_2 = arith.constant 0 : i32
    return %c0_i32, %c0_i32_0, %c0_i32_1 : i32, i32, i32
  }
  func.func @transform_2(%arg0: i32) -> (i32, i32) {
    %c0_i32 = arith.constant 0 : i32
    %c0_i32_0 = arith.constant 0 : i32
    %c0_i32_1 = arith.constant 0 : i32
    return %c0_i32, %c0_i32_0 : i32, i32
  }
  func.func @transform_3(%arg0: i32) -> (i32, i32, i32) {
    %c0_i32 = arith.constant 0 : i32
    %c0_i32_0 = arith.constant 0 : i32
    %c0_i32_1 = arith.constant 0 : i32
    return %arg0, %c0_i32, %c0_i32_0 : i32, i32, i32
  }
  func.func @transform_4(%arg0: i32) -> (i32, i32, i32) {
    %c0_i32 = arith.constant 0 : i32
    %c0_i32_0 = arith.constant 0 : i32
    %c0_i32_1 = arith.constant 0 : i32
    return %arg0, %c0_i32, %c0_i32_0 : i32, i32, i32
  }
}

module attributes {stable_mosaic.version = 11 : i64} {
  func.func @_bn_act_kernel(%arg0: i32, %arg1: memref<64x128xbf16, #tpu.memory_space<vmem>>, %arg2: memref<2x128xf32, #tpu.memory_space<vmem>>, %arg3: memref<64x128xbf16, #tpu.memory_space<vmem>>, %arg4: memref<2x128xf32, #tpu.memory_space<vmem>>, %arg5: memref<64x128xf32, #tpu.memory_space<vmem>>) attributes {dimension_semantics = [#tpu.dimension_semantics<parallel>], iteration_bounds = array<i64: 2>, scalar_prefetch = 0 : i64, scratch_operands = 0 : i64, tpu.core_type = #tpu.core_type<tc>, window_params = [{transform_indices = @transform_0, window_bounds = array<i64: 64, 128>}, {pipeline_mode = #tpu.pipeline_mode<synchronous>, transform_indices = @transform_1, window_bounds = array<i64: 2, 128>}, {transform_indices = @transform_2, window_bounds = array<i64: 64, 128>}, {pipeline_mode = #tpu.pipeline_mode<synchronous>, transform_indices = @transform_3, window_bounds = array<i64: 2, 128>}, {transform_indices = @transform_4, window_bounds = array<i64: 64, 128>}]} {
    %c0 = arith.constant 0 : index
    %c0_0 = arith.constant 0 : index
    %0 = vector.load %arg2[%c0, %c0_0] : memref<2x128xf32, #tpu.memory_space<vmem>>, vector<2x128xf32>
    %c0_1 = arith.constant 0 : index
    %c0_2 = arith.constant 0 : index
    %1 = vector.load %arg1[%c0_1, %c0_2] : memref<64x128xbf16, #tpu.memory_space<vmem>>, vector<64x128xbf16>
    %2 = arith.extf %1 : vector<64x128xbf16> to vector<64x128xf32>
    %3 = vector.extract_strided_slice %0 {offsets = [0, 0], sizes = [1, 128], strides = [1, 1]} : vector<2x128xf32> to vector<1x128xf32>
    %4 = vector.broadcast %3 : vector<1x128xf32> to vector<64x128xf32>
    %5 = arith.mulf %2, %4 : vector<64x128xf32>
    %6 = vector.extract_strided_slice %0 {offsets = [1, 0], sizes = [1, 128], strides = [1, 1]} : vector<2x128xf32> to vector<1x128xf32>
    %7 = vector.broadcast %6 : vector<1x128xf32> to vector<64x128xf32>
    %8 = arith.addf %5, %7 : vector<64x128xf32>
    %c0_3 = arith.constant 0 : index
    %c0_4 = arith.constant 0 : index
    %9 = vector.load %arg4[%c0_3, %c0_4] : memref<2x128xf32, #tpu.memory_space<vmem>>, vector<2x128xf32>
    %c0_5 = arith.constant 0 : index
    %c0_6 = arith.constant 0 : index
    %10 = vector.load %arg3[%c0_5, %c0_6] : memref<64x128xbf16, #tpu.memory_space<vmem>>, vector<64x128xbf16>
    %11 = arith.extf %10 : vector<64x128xbf16> to vector<64x128xf32>
    %12 = vector.extract_strided_slice %9 {offsets = [0, 0], sizes = [1, 128], strides = [1, 1]} : vector<2x128xf32> to vector<1x128xf32>
    %13 = vector.broadcast %12 : vector<1x128xf32> to vector<64x128xf32>
    %14 = arith.mulf %11, %13 : vector<64x128xf32>
    %15 = vector.extract_strided_slice %9 {offsets = [1, 0], sizes = [1, 128], strides = [1, 1]} : vector<2x128xf32> to vector<1x128xf32>
    %16 = vector.broadcast %15 : vector<1x128xf32> to vector<64x128xf32>
    %17 = arith.addf %14, %16 : vector<64x128xf32>
    %18 = arith.addf %8, %17 : vector<64x128xf32>
    %cst = arith.constant 0.000000e+00 : f32
    %19 = vector.broadcast %cst : f32 to vector<64x128xf32>
    %20 = arith.maximumf %18, %19 : vector<64x128xf32>
    %c0_7 = arith.constant 0 : index
    %c0_8 = arith.constant 0 : index
    %21 = vector.load %arg5[%c0_7, %c0_8] : memref<64x128xf32, #tpu.memory_space<vmem>>, vector<64x128xf32>
    tpu.vector_store %arg5[%c0_7, %c0_8], %20 {strides = array<i32>} : memref<64x128xf32, #tpu.memory_space<vmem>>, vector<64x128xf32>,
    return
  }
  func.func @transform_0(%arg0: i32) -> (i32, i32) {
    %c0_i32 = arith.constant 0 : i32
    %c0_i32_0 = arith.constant 0 : i32
    return %arg0, %c0_i32 : i32, i32
  }
  func.func @transform_1(%arg0: i32) -> (i32, i32) {
    %c0_i32 = arith.constant 0 : i32
    %c0_i32_0 = arith.constant 0 : i32
    %c0_i32_1 = arith.constant 0 : i32
    return %c0_i32, %c0_i32_0 : i32, i32
  }
  func.func @transform_2(%arg0: i32) -> (i32, i32) {
    %c0_i32 = arith.constant 0 : i32
    %c0_i32_0 = arith.constant 0 : i32
    return %arg0, %c0_i32 : i32, i32
  }
  func.func @transform_3(%arg0: i32) -> (i32, i32) {
    %c0_i32 = arith.constant 0 : i32
    %c0_i32_0 = arith.constant 0 : i32
    %c0_i32_1 = arith.constant 0 : i32
    return %c0_i32, %c0_i32_0 : i32, i32
  }
  func.func @transform_4(%arg0: i32) -> (i32, i32) {
    %c0_i32 = arith.constant 0 : i32
    %c0_i32_0 = arith.constant 0 : i32
    return %arg0, %c0_i32 : i32, i32
  }
}

</mosaic_0001>

<bundles_post_ra>
// kernel: basic_block_forward.5
= control target key start
LH: loop header
LB: loop body
LE: loop exit
PB: predicated region body
PF: predicated region fallthrough
CT: control target
= control target key end

     0   :  { %s578_s12 = smov 0   ;;  %s606_s0 = inlined_call_operand.vmem [shape: bf16[128,4], index: 0, kind: input, shape index: {}]   ;;  %s607_s1 = inlined_call_operand.vmem [shape: bf16[4,128], index: 1, kind: input, shape index: {}]   ;;  %s608_s2 = inlined_call_operand.vmem [shape: bf16[128,128], index: 2, kind: output, shape index: {0}]   ;;  %s609_s3 = inlined_call_operand.vmem [shape: f32[2,2,128], index: 3, kind: output, shape index: {1}]  }
   0x1 LB: > { %s584_s13 = sadd.s32 4294967295, %s556_s12   ;;  %p464_p0 = scmp.ge.s32.totalorder %s556_s12, 1  ;;  %s556_s12 = sphi %s578_s12, %s14_s12  }
   0x2   : > { %p141_p1 = scmp.lt.s32.totalorder %s556_s12, 3 }
   0x4   : > { %p142_p2 = pnand %p464_p0, %p141_p1 }
   0x5   : > { %v194_v0 = vld [vmem:[%s607_s1] sm:$0x3] (!%p142_p2)  ;;  %vm228_vm0 = vcmask (!%p142_p2), 1041408   ;;  %s465_s16 = sshll.u32 (!%p142_p2), %s584_s13, 3  ;;  %vm215_vm1 = vcmask (!%p142_p2), 31744   ;;  %p181_p4 = scmp.lt.s32.totalorder (!%p142_p2), %s584_s13, 1 }
   0x6   : > { %145 = sbr.rel (%p142_p2) target bundleno = 262 (0x106), region = 28  ;;  %536 = vmatprep.subr.msk.bf16.mxu0 (!%p142_p2), %vm228_vm0, %v194_v0  ;;  %v230_v1 = vsel (!%p142_p2), %vm228_vm0, %v194_v0, 0  ;;  %p170_p3 = scmp.lt.s32.totalorder (!%p142_p2), %s465_s16, 15  ;;  %537 = vmatprep.subr.msk.bf16.mxu1 (!%p142_p2), %vm228_vm0, %v194_v0 }
   0x7   : > { %525 = vmatpush3.bf16.msra.mxu0 (!%p142_p2), %v230_v1  ;;  %535 = vmatpush3.bf16.msra.mxu1 (!%p142_p2), %v230_v1 }
   0xd   : > { %s611_s16 = smov (!%p170_p3, %s465_s16), 15  ;;  %s613_s13 = smov (!%p181_p4, %s584_s13), 1 }
   0xe   : > { %s466_s17 = sshll.u32 %s611_s16, 2  ;;  %s469_s24 = sshll.u32 %s613_s13, 1 }
   0xf   : > { %s173_s20 = scalar_lea.vmem %s606_s0, %s466_s17  ;;  %s179_s23 = scalar_lea.vmem %s608_s2, %s466_s17 }
  0x10   : > { %v546_v2 = vld [vmem:[%s173_s20] sm:$0xff]   ;;  %v547_v3 = vld [vmem:[%s173_s20 + $0x8] sm:$0xff]   ;;  %v548_v4 = vld [vmem:[%s173_s20 + $0x10] sm:$0xff]   ;;  %s184_s27 = scalar_lea.vmem %s609_s3, %s469_s24 }
  0x11   : > { %526 = vmatprep.mubr.msk.bf16.mxu0 %vm215_vm1, %v546_v2  ;;  %v549_v5 = vld [vmem:[%s173_s20 + $0x18] sm:$0xff]   ;;  %530 = vmatprep.mubr.msk.bf16.mxu1 %vm215_vm1, %v548_v4 }
  0x12   : > { %527 = vmatmul.mubr.msk.bf16.vlgmr.msra.gmra.mrb[0].mxu0 %vm215_vm1, %v547_v3  ;;  %531 = vmatmul.mubr.msk.bf16.vlgmr.msra.gmra.mrb[0].mxu1 %vm215_vm1, %v549_v5 }
  0xe5   : > { %v528_v6 = vpop.f32.mrb[0].mxu0  ;;  %v532_v9 = vpop.f32.mrb[0].mxu1 }
  0xe6   : > { %v266_v7 = vpop.f32.mrb[1].mxu0  ;;  %v282_v12 = vpop.f32.mrb[1].mxu1  ;;  %v353_v20 = vmul.f32 %v528_v6, %v528_v6  ;;  %v357_v33 = vmul.f32 %v532_v9, %v532_v9 }
  0xe7   : > { %v529_v8 = vpop.f32.mrb[2].mxu0  ;;  %v351_v13 = vmul.f32 %v266_v7, %v266_v7  ;;  %v533_v17 = vpop.f32.mrb[2].mxu1  ;;  %v355_v27 = vmul.f32 %v282_v12, %v282_v12 }
  0xe8   : > { %v504_v10 = vpack.c.bf16 %v529_v8, %v528_v6  ;;  %v269_v11 = vpop.f32.mrb[3].mxu0  ;;  %v514_v18 = vpack.c.bf16 %v533_v17, %v532_v9  ;;  %v285_v19 = vpop.f32.mrb[3].mxu1  ;;  %v354_v24 = vmul.f32 %v529_v8, %v529_v8  ;;  %v358_v36 = vmul.f32 %v533_v17, %v533_v17 }
  0xe9   : > { %v499_v14 = vpack.c.bf16 %v269_v11, %v266_v7  ;;  %v337_v15 = vadd.f32 %v269_v11, %v266_v7  ;;  %v352_v16 = vmul.f32 %v269_v11, %v269_v11  ;;  %v509_v23 = vpack.c.bf16 %v285_v19, %v282_v12 }
  0xea   : > { %516 = vst [vmem:[%s179_s23 + $0x8] sm:$0xff] %v504_v10   ;;  %518 = vst [vmem:[%s179_s23 + $0x18] sm:$0xff] %v514_v18   ;;  %v356_v32 = vmul.f32 %v285_v19, %v285_v19 }
  0xeb   : > { %500 = vst [vmem:[%s179_s23] sm:$0xff] %v499_v14   ;;  %v338_v21 = vadd.f32 %v528_v6, %v337_v15  ;;  %v359_v22 = vadd.f32 %v352_v16, %v351_v13  ;;  %517 = vst [vmem:[%s179_s23 + $0x10] sm:$0xff] %v509_v23  }
  0xed   : > { %v360_v25 = vadd.f32 %v359_v22, %v353_v20  ;;  %v339_v26 = vadd.f32 %v529_v8, %v338_v21 }
  0xef   : > { %v340_v28 = vadd.f32 %v339_v26, %v282_v12  ;;  %v361_v29 = vadd.f32 %v360_v25, %v354_v24 }
  0xf1   : > { %v362_v30 = vadd.f32 %v361_v29, %v355_v27  ;;  %v341_v31 = vadd.f32 %v340_v28, %v285_v19 }
  0xf3   : > { %v342_v34 = vadd.f32 %v532_v9, %v341_v31  ;;  %v363_v35 = vadd.f32 %v362_v30, %v356_v32 }
  0xf5   : > { %v343_v37 = vadd.f32 %v533_v17, %v342_v34  ;;  %v364_v38 = vadd.f32 %v363_v35, %v357_v33 }
  0xf7   : > { %v344_v39 = vrot.slane %v343_v37, 4  ;;  %v365_v40 = vadd.f32 %v364_v38, %v358_v36 }
  0xf9   : > { %v345_v41 = vadd.f32 %v344_v39, %v343_v37  ;;  %v366_v42 = vrot.slane %v365_v40, 4 }
  0xfb   : > { %v346_v43 = vrot.slane %v345_v41, 2  ;;  %v367_v44 = vadd.f32 %v366_v42, %v365_v40 }
  0xfd   : > { %v347_v45 = vadd.f32 %v346_v43, %v345_v41  ;;  %v368_v46 = vrot.slane %v367_v44, 2 }
  0xff   : > { %v348_v47 = vrot.slane %v347_v45, 1  ;;  %v369_v48 = vadd.f32 %v368_v46, %v367_v44 }
 0x101   : > { %v349_v49 = vadd.f32 %v348_v47, %v347_v45  ;;  %v370_v50 = vrot.slane %v369_v48, 1 }
 0x103   : > { %350 = vst [vmem:[%s184_s27] sm:$0x1] %v349_v49  ;;  %v371_v51 = vadd.f32 %v370_v50, %v369_v48 }
 0x105   : > { %372 = vst [vmem:[%s184_s27 + $0x1] sm:$0x1] %v371_v51 }
 0x106 PF: > { %s14_s12 = sadd.s32 1, %s556_s12  }
 0x107   : > { %p11_p5 = scmp.ge.s32.totalorder %s14_s12, 4  }
 0x109   :  { %13 = sbr.rel (!%p11_p5) target bundleno = 1 (0x1), region = 70 }

// kernel: basic_block_forward.4
= control target key start
LH: loop header
LB: loop body
LE: loop exit
PB: predicated region body
PF: predicated region fallthrough
CT: control target
= control target key end

     0   :  { %s613_s12 = smov 0   ;;  %s647_s0 = inlined_call_operand.vmem [shape: bf16[128,36], index: 0, kind: input, shape index: {}]   ;;  %s648_s1 = inlined_call_operand.vmem [shape: bf16[36,128], index: 1, kind: input, shape index: {}]   ;;  %s649_s2 = inlined_call_operand.vmem [shape: bf16[128,128], index: 2, kind: output, shape index: {0}]   ;;  %s650_s3 = inlined_call_operand.vmem [shape: f32[2,2,128], index: 3, kind: output, shape index: {1}]  }
   0x1 LB: > { %s619_s13 = sadd.s32 4294967295, %s591_s12   ;;  %p483_p0 = scmp.ge.s32.totalorder %s591_s12, 1  ;;  %s591_s12 = sphi %s613_s12, %s14_s12  }
   0x2   : > { %p141_p1 = scmp.lt.s32.totalorder %s591_s12, 3 }
   0x4   : > { %p142_p2 = pnand %p483_p0, %p141_p1 }
   0x5   : > { %v578_v0 = vld [vmem:[%s648_s1] sm:$0xff] (!%p142_p2)   ;;  %v579_v1 = vld [vmem:[%s648_s1 + $0x8] sm:$0xff] (!%p142_p2)   ;;  %s484_s18 = sshll.u32 (!%p142_p2), %s619_s13, 3  ;;  %v580_v2 = vld [vmem:[%s648_s1 + $0x10] ss:$0 sps:$4 sm:$0x33] (!%p142_p2)  }
   0x6   : > { %145 = sbr.rel (%p142_p2) target bundleno = 262 (0x106), region = 28  ;;  %548 = vmatprep.subr.bf16.mxu0 (!%p142_p2), %v578_v0  ;;  %562 = vmatprep.subr.bf16.mxu1 (!%p142_p2), %v578_v0  ;;  %p170_p3 = scmp.lt.s32.totalorder (!%p142_p2), %s484_s18, 15  ;;  %vm247_vm0 = vcmask (!%p142_p2), 1041408   ;;  %vm234_vm1 = vcmask (!%p142_p2), 293888  }
   0x7   : > { %549 = vmatpush3.bf16.msra.mxu0 (!%p142_p2), %v578_v0  ;;  %565 = vmatpush3.bf16.msra.mxu1 (!%p142_p2), %v578_v0  ;;  %v249_v3 = vsel (!%p142_p2), %vm247_vm0, %v580_v2, 0  ;;  %p181_p4 = scmp.lt.s32.totalorder (!%p142_p2), %s619_s13, 1 }
   0x8   : > { %550 = vmatprep.subr.bf16.mxu0 (!%p142_p2), %v579_v1  ;;  %563 = vmatprep.subr.bf16.mxu1 (!%p142_p2), %v579_v1 }
   0xb   : > { %551 = vmatpush3.bf16.msra.mxu0 (!%p142_p2), %v579_v1  ;;  %566 = vmatpush3.bf16.msra.mxu1 (!%p142_p2), %v579_v1 }
   0xc   : > { %568 = vmatprep.subr.msk.bf16.mxu0 (!%p142_p2), %vm247_vm0, %v580_v2  ;;  %569 = vmatprep.subr.msk.bf16.mxu1 (!%p142_p2), %vm247_vm0, %v580_v2 }
   0xd   : > { %s652_s18 = smov (!%p170_p3, %s484_s18), 15  ;;  %s654_s13 = smov (!%p181_p4, %s619_s13), 1 }
   0xe   : > { %s485_s21 = sshll.u32 %s652_s18, 2  ;;  %s488_s28 = sshll.u32 %s654_s13, 1 }
   0xf   : > { %s173_s24 = scalar_lea.vmem %s647_s0, %s485_s21  ;;  %553 = vmatpush3.bf16.msra.mxu0 %v249_v3  ;;  %567 = vmatpush3.bf16.msra.mxu1 %v249_v3  ;;  %s179_s27 = scalar_lea.vmem %s649_s2, %s485_s21 }
  0x10   : > { %v581_v4 = vld [vmem:[%s173_s24] sm:$0xff]   ;;  %v582_v5 = vld [vmem:[%s173_s24 + $0x8] sm:$0xff]   ;;  %v583_v6 = vld [vmem:[%s173_s24 + $0x10] sm:$0xff]   ;;  %s184_s4 = scalar_lea.vmem %s650_s3, %s488_s28 }
  0x11   : > { %554 = vmatprep.mubr.msk.bf16.mxu0 %vm234_vm1, %v581_v4  ;;  %v584_v7 = vld [vmem:[%s173_s24 + $0x18] sm:$0xff]   ;;  %558 = vmatprep.mubr.msk.bf16.mxu1 %vm234_vm1, %v583_v6 }
  0x12   : > { %555 = vmatmul.mubr.msk.bf16.vlgmr.msra.gmra.mrb[0].mxu0 %vm234_vm1, %v582_v5  ;;  %559 = vmatmul.mubr.msk.bf16.vlgmr.msra.gmra.mrb[0].mxu1 %vm234_vm1, %v584_v7 }
  0xe5   : > { %v556_v8 = vpop.f32.mrb[0].mxu0  ;;  %v560_v9 = vpop.f32.mrb[0].mxu1 }
  0xe6   : > { %v285_v10 = vpop.f32.mrb[1].mxu0  ;;  %v301_v11 = vpop.f32.mrb[1].mxu1  ;;  %v372_v23 = vmul.f32 %v556_v8, %v556_v8  ;;  %v376_v35 = vmul.f32 %v560_v9, %v560_v9 }
  0xe7   : > { %v557_v12 = vpop.f32.mrb[2].mxu0  ;;  %v561_v13 = vpop.f32.mrb[2].mxu1  ;;  %v370_v14 = vmul.f32 %v285_v10, %v285_v10  ;;  %v374_v29 = vmul.f32 %v301_v11, %v301_v11 }
  0xe8   : > { %v526_v15 = vpack.c.bf16 %v557_v12, %v556_v8  ;;  %v288_v16 = vpop.f32.mrb[3].mxu0  ;;  %v536_v17 = vpack.c.bf16 %v561_v13, %v560_v9  ;;  %v304_v18 = vpop.f32.mrb[3].mxu1  ;;  %v373_v26 = vmul.f32 %v557_v12, %v557_v12  ;;  %v377_v38 = vmul.f32 %v561_v13, %v561_v13 }
  0xe9   : > { %v521_v19 = vpack.c.bf16 %v288_v16, %v285_v10  ;;  %v356_v20 = vadd.f32 %v288_v16, %v285_v10  ;;  %v371_v21 = vmul.f32 %v288_v16, %v288_v16  ;;  %v531_v22 = vpack.c.bf16 %v304_v18, %v301_v11 }
  0xea   : > { %538 = vst [vmem:[%s179_s27 + $0x8] sm:$0xff] %v526_v15   ;;  %540 = vst [vmem:[%s179_s27 + $0x18] sm:$0xff] %v536_v17   ;;  %v375_v34 = vmul.f32 %v304_v18, %v304_v18 }
  0xeb   : > { %522 = vst [vmem:[%s179_s27] sm:$0xff] %v521_v19   ;;  %v357_v24 = vadd.f32 %v556_v8, %v356_v20  ;;  %v378_v25 = vadd.f32 %v371_v21, %v370_v14  ;;  %539 = vst [vmem:[%s179_s27 + $0x10] sm:$0xff] %v531_v22  }
  0xed   : > { %v379_v27 = vadd.f32 %v378_v25, %v372_v23  ;;  %v358_v28 = vadd.f32 %v557_v12, %v357_v24 }
  0xef   : > { %v359_v30 = vadd.f32 %v358_v28, %v301_v11  ;;  %v380_v31 = vadd.f32 %v379_v27, %v373_v26 }
  0xf1   : > { %v381_v32 = vadd.f32 %v380_v31, %v374_v29  ;;  %v360_v33 = vadd.f32 %v359_v30, %v304_v18 }
  0xf3   : > { %v361_v36 = vadd.f32 %v560_v9, %v360_v33  ;;  %v382_v37 = vadd.f32 %v381_v32, %v375_v34 }
  0xf5   : > { %v362_v39 = vadd.f32 %v561_v13, %v361_v36  ;;  %v383_v40 = vadd.f32 %v382_v37, %v376_v35 }
  0xf7   : > { %v363_v41 = vrot.slane %v362_v39, 4  ;;  %v384_v42 = vadd.f32 %v383_v40, %v377_v38 }
  0xf9   : > { %v364_v43 = vadd.f32 %v363_v41, %v362_v39  ;;  %v385_v44 = vrot.slane %v384_v42, 4 }
  0xfb   : > { %v365_v45 = vrot.slane %v364_v43, 2  ;;  %v386_v46 = vadd.f32 %v385_v44, %v384_v42 }
  0xfd   : > { %v366_v47 = vadd.f32 %v365_v45, %v364_v43  ;;  %v387_v48 = vrot.slane %v386_v46, 2 }
  0xff   : > { %v367_v49 = vrot.slane %v366_v47, 1  ;;  %v388_v50 = vadd.f32 %v387_v48, %v386_v46 }
 0x101   : > { %v368_v51 = vadd.f32 %v367_v49, %v366_v47  ;;  %v389_v52 = vrot.slane %v388_v50, 1 }
 0x103   : > { %369 = vst [vmem:[%s184_s4] sm:$0x1] %v368_v51  ;;  %v390_v53 = vadd.f32 %v389_v52, %v388_v50 }
 0x105   : > { %391 = vst [vmem:[%s184_s4 + $0x1] sm:$0x1] %v390_v53 }
 0x106 PF: > { %s14_s12 = sadd.s32 1, %s591_s12  }
 0x107   : > { %p11_p5 = scmp.ge.s32.totalorder %s14_s12, 4  }
 0x109   :  { %13 = sbr.rel (!%p11_p5) target bundleno = 1 (0x1), region = 70 }

// kernel: basic_block_forward.7
= control target key start
LH: loop header
LB: loop body
LE: loop exit
PB: predicated region body
PF: predicated region fallthrough
CT: control target
= control target key end

     0   :  { %s489_s15 = smov 0   ;;  %s581_s0 = inlined_call_operand.vmem [shape: bf16[128,128], index: 0, kind: input, shape index: {}]   ;;  %s582_s1 = inlined_call_operand.vmem [shape: f32[2,128], index: 1, kind: input, shape index: {}]   ;;  %s583_s2 = inlined_call_operand.vmem [shape: bf16[128,128], index: 2, kind: input, shape index: {}]   ;;  %s584_s3 = inlined_call_operand.vmem [shape: f32[2,128], index: 3, kind: input, shape index: {}]   ;;  %s585_s4 = inlined_call_operand.vmem [shape: f32[128,128], index: 4, kind: output, shape index: {}]  }
   0x1 LB: > { %s397_s16 = sadd.s32 4294967295, %s462_s15   ;;  %p401_p0 = scmp.ge.s32.totalorder %s462_s15, 1  ;;  %s462_s15 = sphi %s489_s15, %s14_s15  }
   0x2   : > { %p174_p1 = scmp.lt.s32.totalorder %s462_s15, 3 }
   0x4   : > { %p175_p2 = pnand %p401_p0, %p174_p1 }
   0x5   : > { %s402_s17 = sshll.u32 (!%p175_p2), %s397_s16, 3  ;;  %v240_v0 = vlaneseq (!%p175_p2)  ;;  %v223_v2 = vld [vmem:[%s582_s1] sm:$0x3] (!%p175_p2) }
   0x6   : > { %178 = sbr.rel (%p175_p2) target bundleno = 39 (0x27), region = 36  ;;  %p206_p3 = scmp.lt.s32.totalorder (!%p175_p2), %s402_s17, 15  ;;  %v264_v3 = vld [vmem:[%s584_s3] sm:$0x3] (!%p175_p2) }
   0x7   : > { %v241_v1 = vshrl.u32 (!%p175_p2), %v240_v0, 7 }
   0x9   : > { %v242_v4 = vsub.s32 (!%p175_p2), 0, %v241_v1  ;;  %v254_v5 = vsub.s32 (!%p175_p2), 1, %v241_v1 }
   0xb   : > { %v516_v6 = vrot.slane (!%p175_p2), %v223_v2, %v242_v4  ;;  %v518_v7 = vrot.slane (!%p175_p2), %v264_v3, %v242_v4  ;;  %v521_v9 = vrot.slane (!%p175_p2), %v223_v2, %v254_v5  ;;  %v524_v11 = vrot.slane (!%p175_p2), %v264_v3, %v254_v5 }
   0xd   : > { %s587_s17 = smov (!%p206_p3, %s402_s17), 15 }
   0xe   : > { %s403_s22 = sshll.u32 %s587_s17, 2  ;;  %s407_s29 = sshll.u32 %s587_s17, 3 }
   0xf   : > { %s509_s25 = scalar_lea.vmem %s581_s0, %s403_s22  ;;  %s514_s28 = scalar_lea.vmem %s583_s2, %s403_s22 }
  0x10   : > { %v411_v8 = vld [vmem:[%s509_s25] sm:$0xff]   ;;  %v442_v12 = vld [vmem:[%s509_s25 + $0x8] sm:$0xff]   ;;  %v443_v30 = vld [vmem:[%s509_s25 + $0x10] sm:$0xff]   ;;  %s550_s6 = scalar_lea.vmem %s585_s4, %s407_s29 }
  0x11   : > { %v427_v10 = vld [vmem:[%s514_s28] sm:$0xff]   ;;  %v412_v13 = vunpack.c.l.bf16 %v411_v8  ;;  %v413_v15 = vunpack.c.h.bf16 %v411_v8  ;;  %v445_v17 = vld [vmem:[%s514_s28 + $0x8] sm:$0xff]   ;;  %v416_v18 = vunpack.c.l.bf16 %v442_v12  ;;  %v417_v20 = vunpack.c.h.bf16 %v442_v12  ;;  %v446_v31 = vld [vmem:[%s514_s28 + $0x10] sm:$0xff]  }
  0x12   : > { %v428_v14 = vunpack.c.l.bf16 %v427_v10  ;;  %v429_v16 = vunpack.c.h.bf16 %v427_v10  ;;  %v432_v19 = vunpack.c.l.bf16 %v445_v17  ;;  %v433_v21 = vunpack.c.h.bf16 %v445_v17  ;;  %v444_v48 = vld [vmem:[%s509_s25 + $0x18] sm:$0xff]  }
  0x13   : > { %v244_v22 = vmul.f32 %v412_v13, %v516_v6  ;;  %v245_v24 = vmul.f32 %v413_v15, %v516_v6  ;;  %v246_v26 = vmul.f32 %v416_v18, %v516_v6  ;;  %v247_v28 = vmul.f32 %v417_v20, %v516_v6  ;;  %v447_v49 = vld [vmem:[%s514_s28 + $0x18] sm:$0xff]  }
  0x14   : > { %v285_v23 = vmul.f32 %v428_v14, %v518_v7  ;;  %v286_v25 = vmul.f32 %v429_v16, %v518_v7  ;;  %v287_v27 = vmul.f32 %v432_v19, %v518_v7  ;;  %v288_v29 = vmul.f32 %v433_v21, %v518_v7 }
  0x15   : > { %v256_v32 = vadd.f32 %v521_v9, %v244_v22  ;;  %v257_v34 = vadd.f32 %v521_v9, %v245_v24  ;;  %v258_v36 = vadd.f32 %v521_v9, %v246_v26  ;;  %v259_v38 = vadd.f32 %v521_v9, %v247_v28 }
  0x16   : > { %v297_v33 = vadd.f32 %v524_v11, %v285_v23  ;;  %v298_v35 = vadd.f32 %v524_v11, %v286_v25  ;;  %v299_v37 = vadd.f32 %v524_v11, %v287_v27  ;;  %v300_v39 = vadd.f32 %v524_v11, %v288_v29 }
  0x17   : > { %v420_v42 = vunpack.c.l.bf16 %v443_v30  ;;  %v436_v43 = vunpack.c.l.bf16 %v446_v31  ;;  %v421_v46 = vunpack.c.h.bf16 %v443_v30  ;;  %v437_v47 = vunpack.c.h.bf16 %v446_v31 }
  0x18   : > { %v305_v40 = vadd.f32 %v297_v33, %v256_v32  ;;  %v306_v41 = vadd.f32 %v298_v35, %v257_v34  ;;  %v307_v44 = vadd.f32 %v299_v37, %v258_v36  ;;  %v308_v45 = vadd.f32 %v300_v39, %v259_v38 }
  0x19   : > { %v248_v52 = vmul.f32 %v420_v42, %v516_v6  ;;  %v289_v53 = vmul.f32 %v436_v43, %v518_v7  ;;  %v249_v56 = vmul.f32 %v421_v46, %v516_v6  ;;  %v290_v57 = vmul.f32 %v437_v47, %v518_v7 }
  0x1a   : > { %v313_v50 = vmax.f32 %v305_v40, 0.0  ;;  %v314_v51 = vmax.f32 %v306_v41, 0.0  ;;  %v315_v54 = vmax.f32 %v307_v44, 0.0  ;;  %v316_v55 = vmax.f32 %v308_v45, 0.0 }
  0x1b   : > { %v260_v58 = vadd.f32 %v521_v9, %v248_v52  ;;  %v301_v59 = vadd.f32 %v524_v11, %v289_v53  ;;  %v424_v60 = vunpack.c.l.bf16 %v444_v48  ;;  %v440_v61 = vunpack.c.l.bf16 %v447_v49 }
  0x1c   : > { %321 = vst [vmem:[%s550_s6] sm:$0xff] %v313_v50  ;;  %322 = vst [vmem:[%s550_s6 + $0x8] sm:$0xff] %v314_v51  ;;  %v261_v62 = vadd.f32 %v521_v9, %v249_v56  ;;  %v302_v63 = vadd.f32 %v524_v11, %v290_v57  ;;  %v425_v0 = vunpack.c.h.bf16 %v444_v48  ;;  %v441_v1 = vunpack.c.h.bf16 %v447_v49 }
  0x1d   : > { %323 = vst [vmem:[%s550_s6 + $0x10] sm:$0xff] %v315_v54  ;;  %324 = vst [vmem:[%s550_s6 + $0x18] sm:$0xff] %v316_v55  ;;  %v309_v2 = vadd.f32 %v301_v59, %v260_v58  ;;  %v250_v3 = vmul.f32 %v424_v60, %v516_v6  ;;  %v291_v4 = vmul.f32 %v440_v61, %v518_v7 }
  0x1e   : > { %v310_v5 = vadd.f32 %v302_v63, %v261_v62  ;;  %v251_v8 = vmul.f32 %v425_v0, %v516_v6  ;;  %v292_v10 = vmul.f32 %v441_v1, %v518_v7 }
  0x1f   : > { %v317_v12 = vmax.f32 %v309_v2, 0.0  ;;  %v262_v13 = vadd.f32 %v521_v9, %v250_v3  ;;  %v303_v14 = vadd.f32 %v524_v11, %v291_v4 }
  0x20   : > { %v318_v15 = vmax.f32 %v310_v5, 0.0  ;;  %v263_v16 = vadd.f32 %v521_v9, %v251_v8  ;;  %v304_v17 = vadd.f32 %v524_v11, %v292_v10 }
  0x21   : > { %325 = vst [vmem:[%s550_s6 + $0x20] sm:$0xff] %v317_v12  ;;  %v311_v18 = vadd.f32 %v303_v14, %v262_v13 }
  0x22   : > { %326 = vst [vmem:[%s550_s6 + $0x28] sm:$0xff] %v318_v15  ;;  %v312_v19 = vadd.f32 %v304_v17, %v263_v16 }
  0x23   : > { %v319_v20 = vmax.f32 %v311_v18, 0.0 }
  0x24   : > { %v320_v21 = vmax.f32 %v312_v19, 0.0 }
  0x25   : > { %327 = vst [vmem:[%s550_s6 + $0x30] sm:$0xff] %v319_v20 }
  0x26   : > { %328 = vst [vmem:[%s550_s6 + $0x38] sm:$0xff] %v320_v21 }
  0x27 PF: > { %s14_s15 = sadd.s32 1, %s462_s15  }
  0x28   : > { %p11_p4 = scmp.ge.s32.totalorder %s14_s15, 4  }
  0x2a   :  { %13 = sbr.rel (!%p11_p4) target bundleno = 1 (0x1), region = 69 }

// kernel: basic_block_forward.6
= control target key start
LH: loop header
LB: loop body
LE: loop exit
PB: predicated region body
PF: predicated region fallthrough
CT: control target
= control target key end

     0   :  { %s2870_s15 = smov 0   ;;  %s3495_s0 = inlined_call_operand.vmem [shape: bf16[2,8,8,128], index: 0, kind: input, shape index: {}]   ;;  %s3496_s1 = inlined_call_operand.vmem [shape: bf16[9,128,128], index: 1, kind: input, shape index: {}]   ;;  %s3497_s2 = inlined_call_operand.vmem [shape: f32[2,128], index: 2, kind: input, shape index: {}]   ;;  %s3498_s3 = inlined_call_operand.vmem [shape: bf16[2,64,128], index: 3, kind: output, shape index: {0}]   ;;  %s3499_s4 = inlined_call_operand.vmem [shape: f32[2,2,128], index: 4, kind: output, shape index: {1}]  }
   0x1 LB: > { %s2025_s16 = sadd.s32 4294967295, %s2842_s15   ;;  %p2029_p0 = scmp.ge.s32.totalorder %s2842_s15, 1  ;;  %s2842_s15 = sphi %s2870_s15, %s15_s15  }
   0x2   : > { %p165_p1 = scmp.lt.s32.totalorder %s2842_s15, 3 }
   0x4   : > { %p166_p2 = pnand %p2029_p0, %p165_p1 }
   0x5   : > { %v2764_v0 = vld [vmem:[%s3496_s1 + $0xc0] sm:$0xff] (!%p166_p2)   ;;  %v2766_v2 = vld [vmem:[%s3496_s1 + $0xc8] sm:$0xff] (!%p166_p2)   ;;  %p195_p3 = scmp.lt.s32.totalorder (!%p166_p2), %s2025_s16, 1  ;;  %v2768_v4 = vld [vmem:[%s3496_s1 + $0xd0] sm:$0xff] (!%p166_p2)   ;;  %v227_v6 = vlaneseq (!%p166_p2)  ;;  %vm331_vm0 = vcmask (!%p166_p2), 1040384   ;;  %vm342_vm2 = vcmask (!%p166_p2), 1044480  }
   0x6   : > { %169 = sbr.rel (%p166_p2) target bundleno = 430 (0x1ae), region = 32  ;;  %v2765_v1 = vld [vmem:[%s3496_s1 + $0x100] sm:$0xff] (!%p166_p2)   ;;  %2459 = vmatprep.subr.bf16.mxu1 (!%p166_p2), %v2764_v0  ;;  %v2767_v3 = vld [vmem:[%s3496_s1 + $0x108] sm:$0xff] (!%p166_p2)   ;;  %v2769_v5 = vld [vmem:[%s3496_s1 + $0x110] sm:$0xff] (!%p166_p2)   ;;  %vm332_vm1 = vsmask.f32 (!%p166_p2), 256 }
   0x7   : > { %2460 = vmatpush3.bf16.msra.mxu1 (!%p166_p2), %v2764_v0  ;;  %2555 = vmatprep.subr.bf16.mxu0 (!%p166_p2), %v2765_v1  ;;  %v2770_v7 = vld [vmem:[%s3496_s1 + $0xd8] sm:$0xff] (!%p166_p2)   ;;  %v228_v9 = vshrl.u32 (!%p166_p2), %v227_v6, 7  ;;  %v2772_v10 = vld [vmem:[%s3496_s1 + $0xe0] sm:$0xff] (!%p166_p2)   ;;  %v2774_v14 = vld [vmem:[%s3496_s1 + $0xe8] sm:$0xff] (!%p166_p2)   ;;  %vm343_vm3 = vsmask.f32 (!%p166_p2), 4352 }
   0x8   : > { %2461 = vmatprep.subr.bf16.mxu1 (!%p166_p2), %v2766_v2  ;;  %2556 = vmatpush3.bf16.msra.mxu0 (!%p166_p2), %v2765_v1  ;;  %v2771_v8 = vld [vmem:[%s3496_s1 + $0x118] sm:$0xff] (!%p166_p2)   ;;  %v2773_v11 = vld [vmem:[%s3496_s1 + $0x120] sm:$0xff] (!%p166_p2)   ;;  %v2775_v18 = vld [vmem:[%s3496_s1 + $0x128] sm:$0xff] (!%p166_p2)   ;;  %vm813_vm6 = vsmask.f32 (!%p166_p2), 3328  ;;  %vm1383_vm8 = vcmask (!%p166_p2), 1042432  }
   0x9   : > { %2557 = vmatprep.subr.bf16.mxu0 (!%p166_p2), %v2767_v3  ;;  %v229_v12 = vsub.s32 (!%p166_p2), 0, %v228_v9  ;;  %v241_v13 = vsub.s32 (!%p166_p2), 1, %v228_v9  ;;  %v210_v15 = vld [vmem:[%s3497_s2] sm:$0x3] (!%p166_p2)  ;;  %v2776_v28 = vld [vmem:[%s3496_s1 + $0xf0] sm:$0xff] (!%p166_p2)   ;;  %v2778_v35 = vld [vmem:[%s3496_s1 + $0xf8] sm:$0xff] (!%p166_p2)  }
   0xa   : > { %v2777_v30 = vld [vmem:[%s3496_s1 + $0x130] sm:$0xff] (!%p166_p2)   ;;  %v2779_v39 = vld [vmem:[%s3496_s1 + $0x138] sm:$0xff] (!%p166_p2)   ;;  %v2780_v51 = vld [vmem:[%s3496_s1] sm:$0xff] (!%p166_p2)   ;;  %vm814_vm7 = vsmask.f32 (!%p166_p2), 7440  ;;  %vm1384_vm9 = vcmask (!%p166_p2), 1046532  }
   0xb   : > { %2462 = vmatpush3.bf16.msra.mxu1 (!%p166_p2), %v2766_v2  ;;  %v2929_v22 = vrot.slane (!%p166_p2), %v210_v15, %v229_v12  ;;  %v2931_v23 = vrot.slane (!%p166_p2), %v210_v15, %v241_v13  ;;  %v2959_v54 = vld [vmem:[%s3496_s1 + $0x1c0] sm:$0xff] (!%p166_p2)   ;;  %vm2963_vm4 = vmand (!%p166_p2), %vm331_vm0, %vm332_vm1 }
   0xc   : > { %2463 = vmatprep.subr.bf16.mxu1 (!%p166_p2), %v2768_v4  ;;  %2558 = vmatpush3.bf16.msra.mxu0 (!%p166_p2), %v2767_v3  ;;  %vm2969_vm5 = vmand (!%p166_p2), %vm342_vm2, %vm343_vm3 }
   0xd   : > { %s3509_s16 = smov (!%p195_p3, %s2025_s16), 1  ;;  %2559 = vmatprep.subr.bf16.mxu0 %v2769_v5  ;;  %vm3053_vm10 = vmor %vm813_vm6, %vm814_vm7 }
   0xe   : > { %s2299_s7 = sshll.u32 %s3509_s16, 5  ;;  %vm3082_vm11 = vmor %vm1383_vm8, %vm1384_vm9 }
   0xf   : > { %2464 = vmatpush3.bf16.msra.mxu1 %v2768_v4  ;;  %s2916_s14 = scalar_lea.vmem %s3495_s0, %s2299_s7  ;;  %s204_s30 = scalar_lea.vmem %s3498_s3, %s2299_s7 }
  0x10   : > { %2465 = vmatprep.subr.bf16.mxu1 %v2770_v7  ;;  %2560 = vmatpush3.bf16.msra.mxu0 %v2769_v5  ;;  %v2310_v16 = vld [vmem:[%s2916_s14] sm:$0xff]   ;;  %v2345_v17 = vld [vmem:[%s2916_s14 + $0x8] sm:$0xff]   ;;  %v2979_v3 = vld [vmem:[%s2916_s14 + $0x10] sm:$0xff]   ;;  %s2034_s7 = sshll.u32 %s3509_s16, 1 }
  0x11   : > { %2561 = vmatprep.subr.bf16.mxu0 %v2771_v8  ;;  %v2311_v19 = vunpack.c.l.bf16 %v2310_v16  ;;  %v2312_v20 = vunpack.c.h.bf16 %v2310_v16  ;;  %v2315_v21 = vunpack.c.l.bf16 %v2345_v17  ;;  %v2316_v24 = vunpack.c.h.bf16 %v2345_v17  ;;  %s208_s8 = scalar_lea.vmem %s3499_s4, %s2034_s7 }
  0x12   : > { %v2319_v15 = vunpack.c.l.bf16 %v2979_v3 }
  0x13   : > { %2466 = vmatpush3.bf16.msra.mxu1 %v2770_v7  ;;  %v231_v25 = vmul.f32 %v2311_v19, %v2929_v22  ;;  %v232_v26 = vmul.f32 %v2312_v20, %v2929_v22  ;;  %v233_v27 = vmul.f32 %v2315_v21, %v2929_v22  ;;  %v234_v29 = vmul.f32 %v2316_v24, %v2929_v22  ;;  %v2782_v19 = vld [vmem:[%s3496_s1 + $0x8] sm:$0xff]  }
  0x14   : > { %2467 = vmatprep.subr.bf16.mxu1 %v2772_v10  ;;  %2562 = vmatpush3.bf16.msra.mxu0 %v2771_v8  ;;  %v2320_v20 = vunpack.c.h.bf16 %v2979_v3 }
  0x15   : > { %2563 = vmatprep.subr.bf16.mxu0 %v2773_v11  ;;  %v243_v31 = vadd.f32 %v2931_v23, %v231_v25  ;;  %v244_v32 = vadd.f32 %v2931_v23, %v232_v26  ;;  %v245_v33 = vadd.f32 %v2931_v23, %v233_v27  ;;  %v246_v34 = vadd.f32 %v2931_v23, %v234_v29 }
  0x17   : > { %2468 = vmatpush3.bf16.msra.mxu1 %v2772_v10  ;;  %v251_v36 = vmax.f32 %v243_v31, 0.0  ;;  %v252_v37 = vmax.f32 %v244_v32, 0.0  ;;  %v253_v38 = vmax.f32 %v245_v33, 0.0  ;;  %v254_v40 = vmax.f32 %v246_v34, 0.0 }
  0x18   : > { %2469 = vmatprep.subr.bf16.mxu1 %v2774_v14  ;;  %2564 = vmatpush3.bf16.msra.mxu0 %v2773_v11 }
  0x19   : > { %2565 = vmatprep.subr.bf16.mxu0 %v2775_v18  ;;  %v259_v41 = vpack.c.bf16 %v251_v36, %v251_v36  ;;  %v260_v42 = vpack.c.bf16 %v252_v37, %v252_v37  ;;  %v261_v43 = vpack.c.bf16 %v253_v38, %v253_v38  ;;  %v262_v44 = vpack.c.bf16 %v254_v40, %v254_v40 }
  0x1b   : > { %2470 = vmatpush3.bf16.msra.mxu1 %v2774_v14  ;;  %v268_v45 = vshrl.u32 %v259_v41, 16  ;;  %v271_v46 = vshll.u32 %v259_v41, 16  ;;  %v275_v47 = vshrl.u32 %v260_v42, 16  ;;  %v278_v48 = vshll.u32 %v260_v42, 16 }
  0x1c   : > { %2471 = vmatprep.subr.bf16.mxu1 %v2776_v28  ;;  %2566 = vmatpush3.bf16.msra.mxu0 %v2775_v18  ;;  %v282_v49 = vshrl.u32 %v261_v43, 16  ;;  %v285_v50 = vshll.u32 %v261_v43, 16  ;;  %v289_v52 = vshrl.u32 %v262_v44, 16  ;;  %v292_v53 = vshll.u32 %v262_v44, 16  ;;  %v2803_v44 = vld [vmem:[%s3496_s1 + $0x98] sm:$0xff]  }
  0x1d   : > { %2567 = vmatprep.subr.bf16.mxu0 %v2777_v30  ;;  %v270_v55 = vrot.slane %v268_v45, 7  ;;  %v277_v56 = vrot.slane %v275_v47, 7 }
  0x1e   : > { %v284_v57 = vrot.slane %v282_v49, 7  ;;  %v291_v59 = vrot.slane %v289_v52, 7 }
  0x1f   : > { %2472 = vmatpush3.bf16.msra.mxu1 %v2776_v28  ;;  %v273_v60 = vor.u32 %v271_v46, %v270_v55  ;;  %v280_v61 = vor.u32 %v278_v48, %v277_v56 }
  0x20   : > { %2473 = vmatprep.subr.bf16.mxu1 %v2778_v35  ;;  %2568 = vmatpush3.bf16.msra.mxu0 %v2777_v30  ;;  %v287_v63 = vor.u32 %v285_v50, %v284_v57  ;;  %v294_v0 = vor.u32 %v292_v53, %v291_v59  ;;  %v2786_v53 = vld [vmem:[%s3496_s1 + $0x18] sm:$0xff]   ;;  %v235_v59 = vmul.f32 %v2319_v15, %v2929_v22  ;;  %v2788_v15 = vld [vmem:[%s3496_s1 + $0x20] sm:$0xff]  }
  0x21   : > { %2569 = vmatprep.subr.bf16.mxu0 %v2779_v39  ;;  %v334_v1 = vsel %vm2963_vm4, 0, %v273_v60  ;;  %v335_v2 = vsel %vm2963_vm4, 0, %v280_v61  ;;  %v2347_v60 = vld [vmem:[%s2916_s14 + $0x18] sm:$0xff]  }
  0x22   : > { %v336_v4 = vsel %vm2963_vm4, 0, %v287_v63  ;;  %v2985_v5 = vsel %vm2969_vm5, %v334_v1, 0  ;;  %v2989_v6 = vsel %vm2969_vm5, %v335_v2, 0  ;;  %v337_v7 = vsel %vm2963_vm4, 0, %v294_v0 }
  0x23   : > { %2474 = vmatpush3.bf16.msra.mxu1 %v2778_v35  ;;  %v2995_v8 = vsel %vm2969_vm5, %v336_v4, 0  ;;  %v2051_v9 = vcombine.low %v2985_v5, %v2989_v6  ;;  %v3001_v10 = vcombine.low %v2985_v5, %v2985_v5  ;;  %v3005_v11 = vcombine.low %v2989_v6, %v2989_v6 }
  0x24   : > { %2483 = vmatprep.subr.bf16.mxu1 %v2780_v51  ;;  %2570 = vmatpush3.bf16.msra.mxu0 %v2779_v39  ;;  %v3009_v12 = vsel %vm2969_vm5, %v337_v7, 0  ;;  %v3013_v13 = vcombine.high %v2985_v5, %v2985_v5  ;;  %v3017_v14 = vcombine.high %v2989_v6, %v2989_v6  ;;  %v3028_v18 = vcombine.low %v2995_v8, %v2995_v8  ;;  %v2784_v39 = vld [vmem:[%s3496_s1 + $0x10] sm:$0xff]   ;;  %v2819_v7 = vld [vmem:[%s3496_s1 + $0x158] sm:$0xff]  }
  0x25   : > { %2579 = vmatprep.subr.bf16.mxu0 %v2959_v54  ;;  %2475 = vmatprep.mubr.bf16.mxu1 %v2051_v9  ;;  %v2052_v16 = vcombine.low %v2995_v8, %v3009_v12  ;;  %v3024_v17 = vcombine.low %v3009_v12, %v3009_v12  ;;  %v3036_v21 = vcombine.high %v2995_v8, %v2995_v8  ;;  %v831_v24 = vshrl.u32 %v3001_v10, 16 }
  0x26   : > { %v834_v25 = vshll.u32 %v3001_v10, 16  ;;  %v840_v26 = vshll.u32 %v3013_v13, 16  ;;  %v845_v27 = vshrl.u32 %v3005_v11, 16  ;;  %v848_v28 = vshll.u32 %v3005_v11, 16 }
  0x27   : > { %2476 = vmatmul.mubr.bf16.vlgmr.msra.gmra.mrb[0].mxu1 %v2052_v16  ;;  %v854_v29 = vshll.u32 %v3017_v14, 16  ;;  %v859_v30 = vshrl.u32 %v3028_v18, 16  ;;  %v2201_v31 = vrot.slane %v3005_v11, 9  ;;  %v833_v32 = vrot.slane %v831_v24, 4 }
  0x28   : > { %2484 = vmatpush3.bf16.msra.mxu1 %v2780_v51  ;;  %v836_v33 = vrot.slane %v834_v25, 5  ;;  %v862_v34 = vshll.u32 %v3028_v18, 16  ;;  %v842_v35 = vrot.slane %v840_v26, 5  ;;  %v847_v36 = vrot.slane %v845_v27, 4 }
  0x29   : > { %v850_v37 = vrot.slane %v848_v28, 5  ;;  %v861_v38 = vrot.slane %v859_v30, 4  ;;  %2485 = vmatprep.subr.bf16.mxu1 %v2782_v19  ;;  %v856_v41 = vrot.slane %v854_v29, 5  ;;  %v868_v43 = vshll.u32 %v3036_v21, 16 }
  0x2a   : > { %v837_v40 = vor.u32 %v836_v33, %v833_v32  ;;  %v864_v42 = vrot.slane %v862_v34, 5  ;;  %v1396_v46 = vrot.slane %v3017_v14, 5  ;;  %v3060_v47 = vcombine.high %v3009_v12, %v3009_v12 }
  0x2b   : > { %v851_v45 = vor.u32 %v850_v37, %v847_v36  ;;  %v873_v48 = vshrl.u32 %v3024_v17, 16  ;;  %v870_v51 = vrot.slane %v868_v43, 5  ;;  %v876_v52 = vshll.u32 %v3024_v17, 16 }
  0x2c   : > { %v838_v49 = vrot.slane %v837_v40, 4  ;;  %v865_v50 = vor.u32 %v864_v42, %v861_v38  ;;  %2486 = vmatpush3.bf16.msra.mxu1 %v2782_v19  ;;  %v882_v57 = vshll.u32 %v3060_v47, 16  ;;  %v236_v1 = vmul.f32 %v2320_v20, %v2929_v22 }
  0x2d   : > { %v852_v55 = vrot.slane %v851_v45, 4  ;;  %v875_v56 = vrot.slane %v873_v48, 4  ;;  %2487 = vmatprep.subr.bf16.mxu1 %v2784_v39  ;;  %v878_v0 = vrot.slane %v876_v52, 5  ;;  %v247_v4 = vadd.f32 %v2931_v23, %v235_v59 }
  0x2e   : > { %v3072_v61 = vsel %vm3053_vm10, %v838_v49, %v842_v35  ;;  %v866_v63 = vrot.slane %v865_v50, 4  ;;  %v884_v3 = vrot.slane %v882_v57, 5  ;;  %v248_v14 = vadd.f32 %v2931_v23, %v236_v1  ;;  %v2783_v35 = vld [vmem:[%s3496_s1 + $0x1c8] sm:$0xff]   ;;  %v2792_v50 = vld [vmem:[%s3496_s1 + $0x30] sm:$0xff]  }
  0x2f   : > { %v3077_v2 = vsel %vm3053_vm10, %v852_v55, %v856_v41  ;;  %v879_v11 = vor.u32 %v878_v0, %v875_v56  ;;  %v255_v16 = vmax.f32 %v247_v4, 0.0  ;;  %v2323_v19 = vunpack.c.l.bf16 %v2347_v60  ;;  %v2785_v41 = vld [vmem:[%s3496_s1 + $0x1d0] sm:$0xff]   ;;  %v2787_v56 = vld [vmem:[%s3496_s1 + $0x1d8] sm:$0xff]  }
  0x30   : > { %v2162_v9 = vcombine.low %v3072_v61, %v3077_v2  ;;  %2488 = vmatpush3.bf16.msra.mxu1 %v2784_v39  ;;  %v2324_v20 = vunpack.c.h.bf16 %v2347_v60  ;;  %v3094_v24 = vsel %vm3053_vm10, %v866_v63, %v870_v51  ;;  %v256_v26 = vmax.f32 %v248_v14, 0.0 }
  0x31   : > { %2489 = vmatprep.subr.bf16.mxu1 %v2786_v53  ;;  %v880_v25 = vrot.slane %v879_v11, 4  ;;  %v3098_v27 = vsel %vm3082_vm11, %v2201_v31, %v1396_v46  ;;  %v263_v28 = vpack.c.bf16 %v255_v16, %v255_v16  ;;  %v237_v29 = vmul.f32 %v2323_v19, %v2929_v22  ;;  %v2790_v31 = vld [vmem:[%s3496_s1 + $0x28] sm:$0xff]  }
  0x32   : > { %2571 = vmatprep.mubr.bf16.mxu0 %v2162_v9  ;;  %v238_v30 = vmul.f32 %v2324_v20, %v2929_v22  ;;  %v264_v33 = vpack.c.bf16 %v256_v26, %v256_v26  ;;  %v2844_v48 = vmov 0   ;;  %v1400_v52 = vrot.slane %v3036_v21, 5  ;;  %v2789_v26 = vld [vmem:[%s3496_s1 + $0x1e0] sm:$0xff]  }
  0x33   : > { %v3104_v32 = vsel %vm3053_vm10, %v880_v25, %v884_v3  ;;  %v296_v36 = vshrl.u32 %v263_v28, 16  ;;  %v299_v22 = vshll.u32 %v263_v28, 16  ;;  %v249_v37 = vadd.f32 %v2931_v23, %v237_v29  ;;  %v2794_v25 = vld [vmem:[%s3496_s1 + $0x38] sm:$0xff]  }
  0x34   : > { %2490 = vmatpush3.bf16.msra.mxu1 %v2786_v53  ;;  %v2163_v34 = vcombine.low %v3094_v24, %v3104_v32  ;;  %v303_v38 = vshrl.u32 %v264_v33, 16  ;;  %v306_v39 = vshll.u32 %v264_v33, 16  ;;  %v250_v40 = vadd.f32 %v2931_v23, %v238_v30 }
  0x35   : > { %2491 = vmatprep.subr.bf16.mxu1 %v2788_v15  ;;  %v298_v42 = vrot.slane %v296_v36, 7  ;;  %v257_v43 = vmax.f32 %v249_v37, 0.0  ;;  %v3122_v49 = vcombine.low %v2844_v48, %v2844_v48  ;;  %v3130_v55 = vcombine.low %v2844_v48, %v2985_v5 }
  0x36   : > { %2572 = vmatmul.mubr.bf16.vlgmr.msra.gmra.mrb[0].mxu0 %v2163_v34  ;;  %v305_v45 = vrot.slane %v303_v38, 7  ;;  %v258_v46 = vmax.f32 %v250_v40, 0.0  ;;  %v2202_v63 = vrot.slane %v3028_v18, 9  ;;  %v2203_v18 = vrot.slane %v3024_v17, 9 }
  0x37   : > { %2580 = vmatpush3.bf16.msra.mxu0 %v2959_v54  ;;  %v301_v23 = vor.u32 %v299_v22, %v298_v42  ;;  %v265_v51 = vpack.c.bf16 %v257_v43, %v257_v43  ;;  %v3181_v22 = vld [vmem:[%s3496_s1 + $0x180] sm:$0xff]   ;;  %v1404_v21 = vrot.slane %v3060_v47, 5  ;;  %v3276_v47 = vcombine.low %v3077_v2, %v3094_v24 }
  0x38   : > { %2492 = vmatpush3.bf16.msra.mxu1 %v2788_v15  ;;  %2581 = vmatprep.subr.bf16.mxu0 %v2783_v35  ;;  %v308_v53 = vor.u32 %v306_v39, %v305_v45  ;;  %v266_v54 = vpack.c.bf16 %v258_v46, %v258_v46  ;;  %v2797_v24 = vld [vmem:[%s3496_s1 + $0x80] sm:$0xff]  }
  0x39   : > { %2493 = vmatprep.subr.bf16.mxu1 %v2790_v31  ;;  %v338_v57 = vsel %vm2963_vm4, 0, %v301_v23  ;;  %v310_v59 = vshrl.u32 %v265_v51, 16  ;;  %v313_v60 = vshll.u32 %v265_v51, 16  ;;  %v3272_v17 = vsel %vm3082_vm11, %v2203_v18, %v1404_v21 }
  0x3a   : > { %v339_v0 = vsel %vm2963_vm4, 0, %v308_v53  ;;  %v3142_v5 = vsel %vm2969_vm5, %v338_v57, 0  ;;  %v317_v1 = vshrl.u32 %v266_v54, 16  ;;  %v320_v3 = vshll.u32 %v266_v54, 16  ;;  %v2791_v57 = vld [vmem:[%s3496_s1 + $0x1e8] sm:$0xff]  }
  0x3b   : > { %2582 = vmatpush3.bf16.msra.mxu0 %v2783_v35  ;;  %v3146_v4 = vsel %vm2969_vm5, %v339_v0, 0  ;;  %v3150_v9 = vcombine.low %v3142_v5, %v3142_v5  ;;  %v312_v11 = vrot.slane %v310_v59, 7  ;;  %v3154_v14 = vcombine.high %v3142_v5, %v3142_v5 }
  0x3c   : > { %2494 = vmatpush3.bf16.msra.mxu1 %v2790_v31  ;;  %2583 = vmatprep.subr.bf16.mxu0 %v2785_v41  ;;  %v2053_v15 = vcombine.low %v3142_v5, %v3146_v4  ;;  %v3160_v16 = vcombine.low %v3146_v4, %v3146_v4  ;;  %v319_v19 = vrot.slane %v317_v1, 7  ;;  %v3164_v20 = vcombine.high %v3146_v4, %v3146_v4 }
  0x3d   : > { %2495 = vmatprep.subr.bf16.mxu1 %v2792_v50  ;;  %v315_v28 = vor.u32 %v313_v60, %v312_v11  ;;  %v887_v29 = vshrl.u32 %v3150_v9, 16  ;;  %v890_v30 = vshll.u32 %v3150_v9, 16  ;;  %v896_v33 = vshll.u32 %v3154_v14, 16 }
  0x3e   : > { %2479 = vmatprep.mubr.bf16.mxu1 %v2053_v15  ;;  %v322_v34 = vor.u32 %v320_v3, %v319_v19  ;;  %v901_v35 = vshrl.u32 %v3160_v16, 16  ;;  %v904_v31 = vshll.u32 %v3160_v16, 16  ;;  %v910_v36 = vshll.u32 %v3164_v20, 16 }
  0x3f   : > { %2584 = vmatpush3.bf16.msra.mxu0 %v2785_v41  ;;  %v340_v37 = vsel %vm2963_vm4, 0, %v315_v28  ;;  %v889_v38 = vrot.slane %v887_v29, 4  ;;  %v892_v39 = vrot.slane %v890_v30, 5  ;;  %v898_v40 = vrot.slane %v896_v33, 5 }
  0x40   : > { %2585 = vmatprep.subr.bf16.mxu0 %v2787_v56  ;;  %2496 = vmatpush3.bf16.msra.mxu1 %v2792_v50  ;;  %v341_v41 = vsel %vm2963_vm4, 0, %v322_v34  ;;  %v3189_v42 = vsel %vm2969_vm5, %v340_v37, 0  ;;  %v903_v43 = vrot.slane %v901_v35, 4  ;;  %v906_v45 = vrot.slane %v904_v31, 5  ;;  %v2793_v34 = vld [vmem:[%s3496_s1 + $0x1f0] sm:$0xff]  }
  0x41   : > { %2497 = vmatprep.subr.bf16.mxu1 %v2794_v25  ;;  %v3193_v46 = vsel %vm2969_vm5, %v341_v41, 0  ;;  %v3197_v23 = vcombine.low %v3189_v42, %v3189_v42  ;;  %v893_v50 = vor.u32 %v892_v39, %v889_v38  ;;  %v912_v51 = vrot.slane %v910_v36, 5 }
  0x42   : > { %v2054_v58 = vcombine.low %v3189_v42, %v3193_v46  ;;  %v3203_v53 = vcombine.low %v3193_v46, %v3193_v46  ;;  %v907_v54 = vor.u32 %v906_v45, %v903_v43  ;;  %v3207_v62 = vcombine.high %v3189_v42, %v3189_v42 }
  0x43   : > { %2586 = vmatpush3.bf16.msra.mxu0 %v2787_v56  ;;  %v894_v59 = vrot.slane %v893_v50, 4  ;;  %v3214_v56 = vcombine.high %v3193_v46, %v3193_v46  ;;  %v915_v60 = vshrl.u32 %v3197_v23, 16  ;;  %v918_v0 = vshll.u32 %v3197_v23, 16  ;;  %v2795_v50 = vld [vmem:[%s3496_s1 + $0x1f8] sm:$0xff]  }
  0x44   : > { %2587 = vmatprep.subr.bf16.mxu0 %v2789_v26  ;;  %2498 = vmatpush3.bf16.msra.mxu1 %v2794_v25  ;;  %v908_v1 = vrot.slane %v907_v54, 4  ;;  %v924_v3 = vshll.u32 %v3207_v62, 16  ;;  %v929_v11 = vshrl.u32 %v3203_v53, 16  ;;  %v932_v15 = vshll.u32 %v3203_v53, 16 }
  0x45   : > { %2480 = vmatmul.mubr.bf16.gmra.mrb[4].mxu1 %v2054_v58  ;;  %2507 = vmatprep.subr.bf16.mxu1 %v3181_v22  ;;  %v3224_v19 = vsel %vm3053_vm10, %v894_v59, %v898_v40  ;;  %v917_v28 = vrot.slane %v915_v60, 4  ;;  %v920_v29 = vrot.slane %v918_v0, 5  ;;  %v938_v30 = vshll.u32 %v3214_v56, 16  ;;  %v2800_v60 = vld [vmem:[%s3496_s1 + $0x190] sm:$0xff]  }
  0x46   : > { %2499 = vmatprep.mubr.bf16.mxu1 %v3130_v55  ;;  %v817_v25 = vshrl.u32 %v3122_v49, 16  ;;  %v3231_v33 = vsel %vm3053_vm10, %v908_v1, %v912_v51  ;;  %v931_v35 = vrot.slane %v929_v11, 4  ;;  %v926_v37 = vrot.slane %v924_v3, 5 }
  0x47   : > { %2588 = vmatpush3.bf16.msra.mxu0 %v2789_v26  ;;  %v2164_v31 = vcombine.low %v3224_v19, %v3231_v33  ;;  %v921_v36 = vor.u32 %v920_v29, %v917_v28  ;;  %v934_v38 = vrot.slane %v932_v15, 5  ;;  %v2064_v55 = vcombine.low %v2989_v6, %v2995_v8  ;;  %v2798_v8 = vld [vmem:[%s3496_s1 + $0x188] sm:$0xff]  }
  0x48   : > { %2589 = vmatprep.subr.bf16.mxu0 %v2791_v57  ;;  %v820_v26 = vshll.u32 %v3122_v49, 16  ;;  %v940_v39 = vrot.slane %v938_v30, 5  ;;  %v3247_v40 = vsel %vm3082_vm11, %v2202_v63, %v1400_v52  ;;  %v3251_v45 = vcombine.low %v3009_v12, %v3142_v5  ;;  %v2799_v29 = vld [vmem:[%s3496_s1 + $0x88] sm:$0xff]   ;;  %v2804_v30 = vld [vmem:[%s3496_s1 + $0x1a0] sm:$0xff]  }
  0x49   : > { %2575 = vmatprep.mubr.bf16.mxu0 %v2164_v31  ;;  %v922_v41 = vrot.slane %v921_v36, 4  ;;  %v935_v43 = vor.u32 %v934_v38, %v931_v35  ;;  %v3255_v6 = vcombine.low %v3098_v27, %v3247_v40  ;;  %v2101_v52 = vcombine.high %v2844_v48, %v2844_v48  ;;  %v2801_v35 = vld [vmem:[%s3496_s1 + $0x90] sm:$0xff]   ;;  %v2810_v38 = vld [vmem:[%s3496_s1 + $0x1b8] sm:$0xff]  }
  0x4a   : > { %v819_v63 = vrot.slane %v817_v25, 4  ;;  %v822_v51 = vrot.slane %v820_v26, 5  ;;  %v2199_v58 = vrot.slane %v3122_v49, 9  ;;  %v2253_v59 = vcombine.low %v3247_v40, %v3272_v17  ;;  %v2808_v31 = vld [vmem:[%s3496_s1 + $0x1b0] sm:$0xff]   ;;  %v2812_v26 = vld [vmem:[%s3496_s1 + $0x40] sm:$0xff]  }
  0x4b   : > { %2590 = vmatpush3.bf16.msra.mxu0 %v2791_v57  ;;  %v927_v12 = vsel %vm3053_vm10, %v922_v41, %v926_v37  ;;  %v936_v5 = vrot.slane %v935_v43, 4  ;;  %v1388_v57 = vrot.slane %v2101_v52, 5  ;;  %v2207_v2 = vrot.slane %v3203_v53, 9  ;;  %v2805_v37 = vld [vmem:[%s3496_s1 + $0xa0] sm:$0xff]   ;;  %v2814_v41 = vld [vmem:[%s3496_s1 + $0x48] sm:$0xff]   ;;  %v2811_v43 = vld [vmem:[%s3496_s1 + $0xb8] sm:$0xff]  }
  0x4c   : > { %2591 = vmatprep.subr.bf16.mxu0 %v2793_v34  ;;  %v3294_v0 = vcombine.low %v3146_v4, %v3189_v42  ;;  %v823_v1 = vor.u32 %v822_v51, %v819_v63  ;;  %v826_v3 = vshll.u32 %v2101_v52, 16  ;;  %v2802_v4 = vld [vmem:[%s3496_s1 + $0x198] sm:$0xff]   ;;  %v3322_v25 = vcombine.low %v3231_v33, %v927_v12  ;;  %v2806_v33 = vld [vmem:[%s3496_s1 + $0x1a8] sm:$0xff]   ;;  %v2813_v52 = vld [vmem:[%s3496_s1 + $0x140] sm:$0xff]  }
  0x4d   : > { %2500 = vmatmul.mubr.bf16.vlgmr.msra.gmra.mrb[0].mxu1 %v2064_v55  ;;  %v941_v54 = vsel %vm3053_vm10, %v936_v5, %v940_v39  ;;  %v3299_v53 = vsel %vm3082_vm11, %v2199_v58, %v1388_v57  ;;  %v2809_v39 = vld [vmem:[%s3496_s1 + $0xb0] sm:$0xff]   ;;  %v2091_v18 = vcombine.low %v3193_v46, %v2844_v48  ;;  %v2204_v21 = vrot.slane %v3150_v9, 9  ;;  %v2818_v63 = vld [vmem:[%s3496_s1 + $0x58] sm:$0xff]  }
  0x4e   : > { %2508 = vmatpush3.bf16.msra.mxu1 %v3181_v22  ;;  %2503 = vmatprep.mubr.bf16.mxu1 %v3251_v45  ;;  %v2165_v49 = vcombine.low %v927_v12, %v941_v54  ;;  %v1420_v22 = vrot.slane %v3214_v56, 5  ;;  %v3312_v56 = vcombine.low %v3104_v32, %v3224_v19  ;;  %v824_v15 = vrot.slane %v823_v1, 4  ;;  %v2830_v1 = vld [vmem:[%s3496_s1 + $0x210] sm:$0xff]  }
  0x4f   : > { %2592 = vmatpush3.bf16.msra.mxu0 %v2793_v34  ;;  %2509 = vmatprep.subr.bf16.mxu1 %v2798_v8  ;;  %v828_v28 = vrot.slane %v826_v3, 5  ;;  %v2200_v32 = vrot.slane %v3001_v10, 9  ;;  %v1392_v19 = vrot.slane %v3013_v13, 5  ;;  %v2205_v9 = vrot.slane %v3160_v16, 9  ;;  %v2834_v40 = vld [vmem:[%s3496_s1 + $0x230] sm:$0xff]  }
  0x50   : > { %2593 = vmatprep.subr.bf16.mxu0 %v2795_v50  ;;  %2576 = vmatmul.mubr.bf16.gmra.mrb[4].mxu0 %v2165_v49  ;;  %v3303_v11 = vsel %vm3082_vm11, %v2207_v2, %v1420_v22  ;;  %v2206_v46 = vrot.slane %v3197_v23, 9  ;;  %v1416_v5 = vrot.slane %v3207_v62, 5  ;;  %v2817_v23 = vld [vmem:[%s3496_s1 + $0x150] sm:$0xff]   ;;  %v2822_v62 = vld [vmem:[%s3496_s1 + $0x68] sm:$0xff]   ;;  %v2821_v49 = vld [vmem:[%s3496_s1 + $0x160] sm:$0xff]  }
  0x51   : > { %2595 = vmatprep.mubr.bf16.mxu0 %v3276_v47  ;;  %v2280_v42 = vcombine.low %v3303_v11, %v3299_v53  ;;  %v3329_v34 = vsel %vm3053_vm10, %v824_v15, %v828_v28  ;;  %v3341_v13 = vsel %vm3082_vm11, %v2200_v32, %v1392_v19  ;;  %v2828_v2 = vld [vmem:[%s3496_s1 + $0x200] sm:$0xff]   ;;  %v2829_v22 = vld [vmem:[%s3496_s1 + $0x208] sm:$0xff]  }
  0x52   : > { %2510 = vmatpush3.bf16.msra.mxu1 %v2798_v8  ;;  %v2190_v10 = vcombine.low %v941_v54, %v3329_v34  ;;  %v2224_v36 = vcombine.low %v3299_v53, %v3341_v13  ;;  %v2816_v8 = vld [vmem:[%s3496_s1 + $0x50] sm:$0xff]   ;;  %v2134_v12 = vcombine.low %v3329_v34, %v3072_v61  ;;  %v2815_v61 = vld [vmem:[%s3496_s1 + $0x148] sm:$0xff]   ;;  %v2252_v57 = vcombine.low %v3341_v13, %v3098_v27 }
  0x53   : > { %2594 = vmatpush3.bf16.msra.mxu0 %v2795_v50  ;;  %2511 = vmatprep.subr.bf16.mxu1 %v2800_v60  ;;  %v2820_v50 = vld [vmem:[%s3496_s1 + $0x60] sm:$0xff]   ;;  %v2824_v54 = vld [vmem:[%s3496_s1 + $0x70] sm:$0xff]   ;;  %v2823_v27 = vld [vmem:[%s3496_s1 + $0x168] sm:$0xff]  }
  0x54   : > { %2603 = vmatprep.subr.bf16.mxu0 %v2797_v24 }
  0x55   : > { %2504 = vmatmul.mubr.bf16.gmra.mrb[4].mxu1 %v3294_v0 }
  0x56   : > { %2512 = vmatpush3.bf16.msra.mxu1 %v2800_v60  ;;  %2523 = vmatprep.mubr.bf16.mxu1 %v2064_v55  ;;  %v2807_v55 = vld [vmem:[%s3496_s1 + $0xa8] sm:$0xff]   ;;  %v2826_v60 = vld [vmem:[%s3496_s1 + $0x78] sm:$0xff]  }
  0x57   : > { %2513 = vmatprep.subr.bf16.mxu1 %v2802_v4 }
  0x58   : > { %2596 = vmatmul.mubr.bf16.vlgmr.msra.gmra.mrb[0].mxu0 %v3312_v56 }
  0x59   : > { %2604 = vmatpush3.bf16.msra.mxu0 %v2797_v24  ;;  %2599 = vmatprep.mubr.bf16.mxu0 %v3322_v25  ;;  %v2825_v24 = vld [vmem:[%s3496_s1 + $0x170] sm:$0xff]  }
  0x5a   : > { %2514 = vmatpush3.bf16.msra.mxu1 %v2802_v4  ;;  %2605 = vmatprep.subr.bf16.mxu0 %v2799_v29  ;;  %v2832_v4 = vld [vmem:[%s3496_s1 + $0x220] sm:$0xff]  }
  0x5b   : > { %2515 = vmatprep.subr.bf16.mxu1 %v2804_v30 }
  0x5d   : > { %2606 = vmatpush3.bf16.msra.mxu0 %v2799_v29 }
  0x5e   : > { %2516 = vmatpush3.bf16.msra.mxu1 %v2804_v30  ;;  %2607 = vmatprep.subr.bf16.mxu0 %v2801_v35 }
  0x5f   : > { %2517 = vmatprep.subr.bf16.mxu1 %v2806_v33 }
  0x60   : > { %2600 = vmatmul.mubr.bf16.gmra.mrb[4].mxu0 %v2190_v10 }
  0x61   : > { %2608 = vmatpush3.bf16.msra.mxu0 %v2801_v35  ;;  %2619 = vmatprep.mubr.bf16.mxu0 %v2224_v36 }
  0x62   : > { %2518 = vmatpush3.bf16.msra.mxu1 %v2806_v33  ;;  %2609 = vmatprep.subr.bf16.mxu0 %v2803_v44 }
  0x63   : > { %2519 = vmatprep.subr.bf16.mxu1 %v2808_v31 }
  0x65   : > { %2610 = vmatpush3.bf16.msra.mxu0 %v2803_v44 }
  0x66   : > { %2520 = vmatpush3.bf16.msra.mxu1 %v2808_v31  ;;  %2611 = vmatprep.subr.bf16.mxu0 %v2805_v37 }
  0x67   : > { %2521 = vmatprep.subr.bf16.mxu1 %v2810_v38 }
  0x69   : > { %2612 = vmatpush3.bf16.msra.mxu0 %v2805_v37 }
  0x6a   : > { %2522 = vmatpush3.bf16.msra.mxu1 %v2810_v38  ;;  %2613 = vmatprep.subr.bf16.mxu0 %v2807_v55 }
  0x6b   : > { %2531 = vmatprep.subr.bf16.mxu1 %v2812_v26 }
  0x6d   : > { %2524 = vmatmul.mubr.bf16.vlgmr.msra.gmra.mrb[0].mxu1 %v3251_v45  ;;  %2614 = vmatpush3.bf16.msra.mxu0 %v2807_v55  ;;  %v1408_v45 = vrot.slane %v3154_v14, 5  ;;  %v1412_v14 = vrot.slane %v3164_v20, 5  ;;  %v3412_v20 = vsel %vm3082_vm11, %v2206_v46, %v1416_v5 }
  0x6e   : > { %2532 = vmatpush3.bf16.msra.mxu1 %v2812_v26  ;;  %2615 = vmatprep.subr.bf16.mxu0 %v2809_v39  ;;  %v2255_v15 = vcombine.low %v3412_v20, %v3303_v11 }
  0x6f   : > { %2533 = vmatprep.subr.bf16.mxu1 %v2814_v41  ;;  %2527 = vmatprep.mubr.bf16.mxu1 %v3294_v0  ;;  %v3391_v48 = vsel %vm3082_vm11, %v2204_v21, %v1408_v45  ;;  %v1413_v16 = vsel %vm3082_vm11, %v2205_v9, %v1412_v14  ;;  %v2827_v0 = vld [vmem:[%s3496_s1 + $0x178] sm:$0xff]  }
  0x70   : > { %v3405_v51 = vcombine.low %v3272_v17, %v3391_v48  ;;  %v2227_v58 = vcombine.low %v1413_v16, %v3412_v20  ;;  %v2254_v3 = vcombine.low %v3391_v48, %v1413_v16  ;;  %v2835_v17 = vld [vmem:[%s3496_s1 + $0x238] sm:$0xff]  }
  0x71   : > { %2616 = vmatpush3.bf16.msra.mxu0 %v2809_v39 }
  0x72   : > { %2534 = vmatpush3.bf16.msra.mxu1 %v2814_v41  ;;  %2617 = vmatprep.subr.bf16.mxu0 %v2811_v43 }
  0x73   : > { %2535 = vmatprep.subr.bf16.mxu1 %v2816_v8 }
  0x75   : > { %2528 = vmatmul.mubr.bf16.gmra.mrb[4].mxu1 %v2091_v18  ;;  %2618 = vmatpush3.bf16.msra.mxu0 %v2811_v43 }
  0x76   : > { %2536 = vmatpush3.bf16.msra.mxu1 %v2816_v8  ;;  %2627 = vmatprep.subr.bf16.mxu0 %v2813_v52 }
  0x77   : > { %2537 = vmatprep.subr.bf16.mxu1 %v2818_v63  ;;  %2547 = vmatprep.mubr.bf16.mxu1 %v2134_v12 }
  0x78   : > { %2620 = vmatmul.mubr.bf16.vlgmr.msra.gmra.mrb[0].mxu0 %v3255_v6 }
  0x79   : > { %2628 = vmatpush3.bf16.msra.mxu0 %v2813_v52  ;;  %2623 = vmatprep.mubr.bf16.mxu0 %v3405_v51 }
  0x7a   : > { %2538 = vmatpush3.bf16.msra.mxu1 %v2818_v63  ;;  %2629 = vmatprep.subr.bf16.mxu0 %v2815_v61 }
  0x7b   : > { %2539 = vmatprep.subr.bf16.mxu1 %v2820_v50 }
  0x7d   : > { %2630 = vmatpush3.bf16.msra.mxu0 %v2815_v61 }
  0x7e   : > { %2540 = vmatpush3.bf16.msra.mxu1 %v2820_v50  ;;  %2631 = vmatprep.subr.bf16.mxu0 %v2817_v23 }
  0x7f   : > { %2541 = vmatprep.subr.bf16.mxu1 %v2822_v62 }
  0x80   : > { %2624 = vmatmul.mubr.bf16.gmra.mrb[4].mxu0 %v2227_v58 }
  0x81   : > { %2632 = vmatpush3.bf16.msra.mxu0 %v2817_v23  ;;  %2643 = vmatprep.mubr.bf16.mxu0 %v2252_v57 }
  0x82   : > { %2542 = vmatpush3.bf16.msra.mxu1 %v2822_v62  ;;  %2633 = vmatprep.subr.bf16.mxu0 %v2819_v7 }
  0x83   : > { %2543 = vmatprep.subr.bf16.mxu1 %v2824_v54 }
  0x85   : > { %2634 = vmatpush3.bf16.msra.mxu0 %v2819_v7 }
  0x86   : > { %2544 = vmatpush3.bf16.msra.mxu1 %v2824_v54  ;;  %2635 = vmatprep.subr.bf16.mxu0 %v2821_v49 }
  0x87   : > { %2545 = vmatprep.subr.bf16.mxu1 %v2826_v60 }
  0x89   : > { %2636 = vmatpush3.bf16.msra.mxu0 %v2821_v49 }
  0x8a   : > { %2546 = vmatpush3.bf16.msra.mxu1 %v2826_v60  ;;  %2637 = vmatprep.subr.bf16.mxu0 %v2823_v27 }
  0x8b   : > { %2675 = vmatprep.subr.bf16.mxu1 %v2828_v2 }
  0x8d   : > { %2548 = vmatmul.mubr.bf16.vlgmr.msra.gmra.mrb[0].mxu1 %v3276_v47  ;;  %2638 = vmatpush3.bf16.msra.mxu0 %v2823_v27  ;;  %v2831_v47 = vld [vmem:[%s3496_s1 + $0x218] sm:$0xff]  }
  0x8e   : > { %2683 = vmatpush3.bf16.msra.mxu1 %v2828_v2  ;;  %2639 = vmatprep.subr.bf16.mxu0 %v2825_v24 }
  0x8f   : > { %2676 = vmatprep.subr.bf16.mxu1 %v2829_v22  ;;  %2551 = vmatprep.mubr.bf16.mxu1 %v3312_v56  ;;  %v2833_v56 = vld [vmem:[%s3496_s1 + $0x228] sm:$0xff]  }
  0x91   : > { %2640 = vmatpush3.bf16.msra.mxu0 %v2825_v24 }
  0x92   : > { %2684 = vmatpush3.bf16.msra.mxu1 %v2829_v22  ;;  %2641 = vmatprep.subr.bf16.mxu0 %v2827_v0 }
  0x93   : > { %2677 = vmatprep.subr.bf16.mxu1 %v2830_v1 }
  0x95   : > { %2552 = vmatmul.mubr.bf16.gmra.mrb[4].mxu1 %v3322_v25  ;;  %2642 = vmatpush3.bf16.msra.mxu0 %v2827_v0 }
  0x96   : > { %2685 = vmatpush3.bf16.msra.mxu1 %v2830_v1  ;;  %2651 = vmatprep.subr.bf16.mxu0 %v2828_v2 }
  0x97   : > { %2678 = vmatprep.subr.bf16.mxu1 %v2831_v47  ;;  %2671 = vmatprep.mubr.bf16.mxu1 %v2227_v58 }
  0x98   : > { %2644 = vmatmul.mubr.bf16.vlgmr.msra.gmra.mrb[0].mxu0 %v2253_v59 }
  0x99   : > { %2652 = vmatpush3.bf16.msra.mxu0 %v2828_v2  ;;  %2647 = vmatprep.mubr.bf16.mxu0 %v2254_v3 }
  0x9a   : > { %2653 = vmatprep.subr.bf16.mxu0 %v2829_v22  ;;  %2686 = vmatpush3.bf16.msra.mxu1 %v2831_v47 }
  0x9b   : > { %2679 = vmatprep.subr.bf16.mxu1 %v2832_v4 }
  0x9d   : > { %2654 = vmatpush3.bf16.msra.mxu0 %v2829_v22 }
  0x9e   : > { %2655 = vmatprep.subr.bf16.mxu0 %v2830_v1  ;;  %2687 = vmatpush3.bf16.msra.mxu1 %v2832_v4 }
  0x9f   : > { %2680 = vmatprep.subr.bf16.mxu1 %v2833_v56 }
  0xa0   : > { %2648 = vmatmul.mubr.bf16.gmra.mrb[4].mxu0 %v2255_v15 }
  0xa1   : > { %2656 = vmatpush3.bf16.msra.mxu0 %v2830_v1  ;;  %2667 = vmatprep.mubr.bf16.mxu0 %v3255_v6 }
  0xa2   : > { %2657 = vmatprep.subr.bf16.mxu0 %v2831_v47  ;;  %2688 = vmatpush3.bf16.msra.mxu1 %v2833_v56 }
  0xa3   : > { %2681 = vmatprep.subr.bf16.mxu1 %v2834_v40 }
  0xa5   : > { %2658 = vmatpush3.bf16.msra.mxu0 %v2831_v47 }
  0xa6   : > { %2659 = vmatprep.subr.bf16.mxu0 %v2832_v4  ;;  %2689 = vmatpush3.bf16.msra.mxu1 %v2834_v40 }
  0xa7   : > { %2682 = vmatprep.subr.bf16.mxu1 %v2835_v17 }
  0xa9   : > { %2660 = vmatpush3.bf16.msra.mxu0 %v2832_v4 }
  0xaa   : > { %2661 = vmatprep.subr.bf16.mxu0 %v2833_v56  ;;  %2690 = vmatpush3.bf16.msra.mxu1 %v2835_v17 }
  0xad   : > { %2662 = vmatpush3.bf16.msra.mxu0 %v2833_v56  ;;  %2672 = vmatmul.mubr.bf16.vlgmr.msra.gmra.mrb[8].mxu1 %v2280_v42 }
  0xae   : > { %2663 = vmatprep.subr.bf16.mxu0 %v2834_v40 }
  0xb1   : > { %2664 = vmatpush3.bf16.msra.mxu0 %v2834_v40 }
  0xb2   : > { %2665 = vmatprep.subr.bf16.mxu0 %v2835_v17 }
  0xb5   : > { %2666 = vmatpush3.bf16.msra.mxu0 %v2835_v17 }
  0xb8   : > { %2668 = vmatmul.mubr.bf16.vlgmr.msra.gmra.mrb[0].mxu0 %v3405_v51 }
 0x160   : > { %v2549_v6 = vpop.f32.mrb[0].mxu1 }
 0x161   : > { %v1057_v59 = vpop.f32.mrb[1].mxu1 }
 0x162   : > { %v2550_v28 = vpop.f32.mrb[2].mxu1 }
 0x163   : > { %v1060_v29 = vpop.f32.mrb[3].mxu1 }
 0x168   : > { %v2553_v30 = vpop.f32.mrb[4].mxu1 }
 0x169   : > { %v1073_v25 = vpop.f32.mrb[5].mxu1 }
 0x16a   : > { %v2554_v32 = vpop.f32.mrb[6].mxu1 }
 0x16b   : > { %v1076_v19 = vpop.f32.mrb[7].mxu1 }
 0x173   : > { %v2649_v34 = vpop.f32.mrb[4].mxu0 }
 0x174   : > { %v2695_v35 = vadd.f32 %v2649_v34, %v2553_v30  ;;  %v1700_v33 = vpop.f32.mrb[5].mxu0 }
 0x175   : > { %v2697_v53 = vadd.f32 %v1700_v33, %v1073_v25  ;;  %v2650_v11 = vpop.f32.mrb[6].mxu0 }
 0x176   : > { %v2699_v42 = vadd.f32 %v2650_v11, %v2554_v32  ;;  %v1703_v10 = vpop.f32.mrb[7].mxu0 }
 0x177   : > { %v2701_v13 = vadd.f32 %v1703_v10, %v1076_v19 }
 0x180   : > { %v2673_v44 = vpop.f32.mrb[8].mxu1 }
 0x181   : > { %v2696_v31 = vadd.f32 %v2695_v35, %v2673_v44  ;;  %v1840_v36 = vpop.f32.mrb[9].mxu1 }
 0x182   : > { %v2698_v37 = vadd.f32 %v2697_v53, %v1840_v36  ;;  %v2674_v38 = vpop.f32.mrb[10].mxu1 }
 0x183   : > { %v2700_v55 = vadd.f32 %v2699_v42, %v2674_v38  ;;  %v1843_v26 = vpop.f32.mrb[11].mxu1  ;;  %v1923_v27 = vmul.f32 %v2696_v31, %v2696_v31 }
 0x184   : > { %v2702_v39 = vadd.f32 %v2701_v13, %v1843_v26  ;;  %v1921_v58 = vmul.f32 %v2698_v37, %v2698_v37 }
 0x185   : > { %v2343_v41 = vpack.c.bf16 %v2700_v55, %v2696_v31  ;;  %v1924_v22 = vmul.f32 %v2700_v55, %v2700_v55 }
 0x186   : > { %v2338_v43 = vpack.c.bf16 %v2702_v39, %v2698_v37  ;;  %v1922_v57 = vmul.f32 %v2702_v39, %v2702_v39 }
 0x187   : > { %2350 = vst [vmem:[%s204_s30 + $0x18] sm:$0xff] %v2343_v41  }
 0x188   : > { %2349 = vst [vmem:[%s204_s30 + $0x10] sm:$0xff] %v2338_v43  }
 0x18b   : > { %v2669_v8 = vpop.f32.mrb[0].mxu0 }
 0x18c   : > { %v2691_v18 = vadd.f32 %v2669_v8, %v2549_v6  ;;  %v1824_v21 = vpop.f32.mrb[1].mxu0 }
 0x18d   : > { %v2692_v45 = vadd.f32 %v1824_v21, %v1057_v59  ;;  %v2670_v52 = vpop.f32.mrb[2].mxu0 }
 0x18e   : > { %v2693_v63 = vadd.f32 %v2670_v52, %v2550_v28  ;;  %v1827_v12 = vpop.f32.mrb[3].mxu0  ;;  %v1919_v50 = vmul.f32 %v2691_v18, %v2691_v18 }
 0x18f   : > { %v2694_v48 = vadd.f32 %v1827_v12, %v1060_v29  ;;  %v1917_v14 = vmul.f32 %v2692_v45, %v2692_v45 }
 0x190   : > { %v2333_v9 = vpack.c.bf16 %v2693_v63, %v2691_v18  ;;  %v1920_v20 = vmul.f32 %v2693_v63, %v2693_v63 }
 0x191   : > { %v2328_v46 = vpack.c.bf16 %v2694_v48, %v2692_v45  ;;  %v1903_v5 = vadd.f32 %v2694_v48, %v2692_v45  ;;  %v1918_v61 = vmul.f32 %v2694_v48, %v2694_v48 }
 0x192   : > { %2348 = vst [vmem:[%s204_s30 + $0x8] sm:$0xff] %v2333_v9  }
 0x193   : > { %2329 = vst [vmem:[%s204_s30] sm:$0xff] %v2328_v46   ;;  %v1904_v51 = vadd.f32 %v2691_v18, %v1903_v5  ;;  %v1925_v16 = vadd.f32 %v1918_v61, %v1917_v14 }
 0x195   : > { %v1905_v23 = vadd.f32 %v2693_v63, %v1904_v51  ;;  %v1926_v62 = vadd.f32 %v1925_v16, %v1919_v50 }
 0x197   : > { %v1906_v7 = vadd.f32 %v2698_v37, %v1905_v23  ;;  %v1927_v54 = vadd.f32 %v1926_v62, %v1920_v20 }
 0x199   : > { %v1907_v49 = vadd.f32 %v2702_v39, %v1906_v7  ;;  %v1928_v60 = vadd.f32 %v1927_v54, %v1921_v58 }
 0x19b   : > { %v1908_v2 = vadd.f32 %v2696_v31, %v1907_v49  ;;  %v1929_v24 = vadd.f32 %v1928_v60, %v1922_v57 }
 0x19d   : > { %v1909_v0 = vadd.f32 %v2700_v55, %v1908_v2  ;;  %v1930_v1 = vadd.f32 %v1929_v24, %v1923_v27 }
 0x19f   : > { %v1910_v47 = vrot.slane %v1909_v0, 4  ;;  %v1931_v3 = vadd.f32 %v1930_v1, %v1924_v22 }
 0x1a1   : > { %v1911_v4 = vadd.f32 %v1910_v47, %v1909_v0  ;;  %v1932_v56 = vrot.slane %v1931_v3, 4 }
 0x1a3   : > { %v1912_v15 = vrot.slane %v1911_v4, 2  ;;  %v1933_v40 = vadd.f32 %v1932_v56, %v1931_v3 }
 0x1a5   : > { %v1913_v17 = vadd.f32 %v1912_v15, %v1911_v4  ;;  %v1934_v6 = vrot.slane %v1933_v40, 2 }
 0x1a7   : > { %v1914_v59 = vrot.slane %v1913_v17, 1  ;;  %v1935_v28 = vadd.f32 %v1934_v6, %v1933_v40 }
 0x1a9   : > { %v1915_v29 = vadd.f32 %v1914_v59, %v1913_v17  ;;  %v1936_v30 = vrot.slane %v1935_v28, 1 }
 0x1ab   : > { %1916 = vst [vmem:[%s208_s8] sm:$0x1] %v1915_v29  ;;  %v1937_v25 = vadd.f32 %v1936_v30, %v1935_v28 }
 0x1ad   : > { %1938 = vst [vmem:[%s208_s8 + $0x1] sm:$0x1] %v1937_v25 }
 0x1ae PF: > { %s15_s15 = sadd.s32 1, %s2842_s15  }
 0x1af   : > { %p12_p4 = scmp.ge.s32.totalorder %s15_s15, 4  }
 0x1b1   :  { %14 = sbr.rel (!%p12_p4) target bundleno = 1 (0x1), region = 82 }

</bundles_post_ra>
